<compile_context>
chip_gen: v6e
topology: v6e:2x2x1
jax: 0.10.0
libtpu: 0.0.40
codegen_flags: <defaults>
</compile_context>

<pallas_src>
import functools

import jax
import jax.numpy as jnp
from jax import lax
from jax.experimental import pallas as pl
from jax.experimental.pallas import tpu as pltpu

_NEG_INF = float(jnp.finfo(jnp.float32).min)
_MM_DTYPE = jnp.bfloat16  # MXU operand dtype; accumulation is always f32


# ----------------------------- tiling helpers -----------------------------

def _row_tile(m, target=256):
    """Largest row tile <= target that divides m and is a multiple of 8 (or full m)."""
    if m <= target:
        return m
    for t in range(target, 7, -8):
        if m % t == 0:
            return t
    return m


def _ff_tile(f, target=512):
    """Largest d_ff tile <= target that divides f and is a multiple of 128 (or full f)."""
    if f <= target:
        return f
    for t in range(target, 127, -128):
        if f % t == 0:
            return t
    return f


# ----------------------------- in-kernel helpers -----------------------------

def _rms(x, w, eps):
    """T5LayerNorm: RMS norm, no mean subtraction, no bias. f32 math."""
    var = jnp.mean(x * x, axis=-1, keepdims=True)
    return (x * lax.rsqrt(var + eps)) * w


def _softmax_rows(scores):
    m = jnp.max(scores, axis=-1, keepdims=True)
    e = jnp.exp(scores - m)
    denom = jnp.sum(e, axis=-1, keepdims=True)
    return e * pl.reciprocal(denom, approx=True)


# ----------------------------- Pallas kernels -----------------------------

def _self_attn_kernel(x_ref, ln_ref, wqkv_ref, wo_ref, bias_ref, o_ref,
                      *, n_heads, d_kv, eps):
    """Fused: RMS-norm -> QKV proj -> causal attention (+rel bias) -> out proj -> +residual."""
    x = x_ref[0]                                   # (S, D) f32
    S = x.shape[0]
    inner = n_heads * d_kv

    normed = _rms(x, ln_ref[0], eps)
    qkv = jnp.dot(normed.astype(_MM_DTYPE), wqkv_ref[...].astype(_MM_DTYPE),
                  preferred_element_type=jnp.float32)          # (S, 3*inner)

    # Causal additive mask built in-kernel (default all-ones attention_mask).
    row = lax.broadcasted_iota(jnp.int32, (S, S), 0)
    col = lax.broadcasted_iota(jnp.int32, (S, S), 1)
    causal = jnp.where(col <= row, 0.0, _NEG_INF)              # (S, S)

    wo = wo_ref[...].astype(_MM_DTYPE)                         # (inner, D)
    acc = jnp.zeros(x.shape, jnp.float32)                      # (S, D)
    for h in range(n_heads):
        q_h = qkv[:, h * d_kv:(h + 1) * d_kv].astype(_MM_DTYPE)
        k_h = qkv[:, inner + h * d_kv: inner + (h + 1) * d_kv].astype(_MM_DTYPE)
        v_h = qkv[:, 2 * inner + h * d_kv: 2 * inner + (h + 1) * d_kv].astype(_MM_DTYPE)
        # T5 attention: no 1/sqrt(d) scaling; contract on d_kv (no K transpose copy).
        scores = lax.dot_general(q_h, k_h, (((1,), (1,)), ((), ())),
                                 preferred_element_type=jnp.float32)   # (S, S)
        scores = scores + bias_ref[h] + causal
        probs = _softmax_rows(scores).astype(_MM_DTYPE)
        ctx = jnp.dot(probs, v_h, preferred_element_type=jnp.float32)  # (S, d_kv)
        # Fused per-head output projection keeps the stored lane dim = d_model.
        acc = acc + jnp.dot(ctx.astype(_MM_DTYPE), wo[h * d_kv:(h + 1) * d_kv, :],
                            preferred_element_type=jnp.float32)
    o_ref[0] = x + acc                                          # residual fused


def _cross_attn_kernel(x_ref, enc_ref, ln_ref, wq_ref, wkv_ref, wo_ref, o_ref,
                       *, n_heads, d_kv, eps):
    """Fused: RMS-norm -> Q proj / KV proj (encoder states) -> attention -> out proj -> +residual."""
    x = x_ref[0]                                   # (S, D)
    enc = enc_ref[0]                               # (Senc, D)
    inner = n_heads * d_kv

    normed = _rms(x, ln_ref[0], eps)
    q = jnp.dot(normed.astype(_MM_DTYPE), wq_ref[...].astype(_MM_DTYPE),
                preferred_element_type=jnp.float32)            # (S, inner)
    kv = jnp.dot(enc.astype(_MM_DTYPE), wkv_ref[...].astype(_MM_DTYPE),
                 preferred_element_type=jnp.float32)           # (Senc, 2*inner)

    wo = wo_ref[...].astype(_MM_DTYPE)
    acc = jnp.zeros(x.shape, jnp.float32)
    for h in range(n_heads):
        q_h = q[:, h * d_kv:(h + 1) * d_kv].astype(_MM_DTYPE)
        k_h = kv[:, h * d_kv:(h + 1) * d_kv].astype(_MM_DTYPE)
        v_h = kv[:, inner + h * d_kv: inner + (h + 1) * d_kv].astype(_MM_DTYPE)
        scores = lax.dot_general(q_h, k_h, (((1,), (1,)), ((), ())),
                                 preferred_element_type=jnp.float32)   # (S, Senc)
        # Default all-ones encoder mask -> additive mask is 0; no cross-attn rel. bias.
        probs = _softmax_rows(scores).astype(_MM_DTYPE)
        ctx = jnp.dot(probs, v_h, preferred_element_type=jnp.float32)
        acc = acc + jnp.dot(ctx.astype(_MM_DTYPE), wo[h * d_kv:(h + 1) * d_kv, :],
                            preferred_element_type=jnp.float32)
    o_ref[0] = x + acc


def _ffn_kernel(x_ref, ln_ref, wi_ref, wo_ref, o_ref, acc_ref, *, eps):
    """Fused: RMS-norm -> wi -> ReLU -> wo (d_ff-tiled accumulation) -> +residual."""
    @pl.when(pl.program_id(1) == 0)
    def _():
        acc_ref[...] = jnp.zeros_like(acc_ref)

    x = x_ref[...]                                             # (tm, D)
    normed = _rms(x, ln_ref[...], eps)
    h = jnp.dot(normed.astype(_MM_DTYPE), wi_ref[...].astype(_MM_DTYPE),
                preferred_element_type=jnp.float32)            # (tm, tf)
    h = jnp.maximum(h, 0.0)                                    # ReLU (DenseReluDense)
    acc_ref[...] += jnp.dot(h.astype(_MM_DTYPE), wo_ref[...].astype(_MM_DTYPE),
                            preferred_element_type=jnp.float32)

    @pl.when(pl.program_id(1) == pl.num_programs(1) - 1)
    def _():
        o_ref[...] = x + acc_ref[...]                          # residual fused


def _rmsnorm_kernel(x_ref, w_ref, o_ref, *, eps):
    o_ref[...] = _rms(x_ref[...], w_ref[...], eps)


# ----------------------------- kernel wrappers -----------------------------

def self_attention_sublayer(hidden, ln_w, wqkv, wo, rel_bias, n_heads, d_kv, eps):
    B, S, D = hidden.shape
    inner = n_heads * d_kv
    return pl.pallas_call(
        functools.partial(_self_attn_kernel, n_heads=n_heads, d_kv=d_kv, eps=eps),
        out_shape=jax.ShapeDtypeStruct((B, S, D), jnp.float32),
        grid=(B,),
        in_specs=[
            pl.BlockSpec((1, S, D), lambda b: (b, 0, 0)),
            pl.BlockSpec((1, D), lambda b: (0, 0)),
            pl.BlockSpec((D, 3 * inner), lambda b: (0, 0)),
            pl.BlockSpec((inner, D), lambda b: (0, 0)),
            pl.BlockSpec((n_heads, S, S), lambda b: (0, 0, 0)),   # shared across batch
        ],
        out_specs=pl.BlockSpec((1, S, D), lambda b: (b, 0, 0)),
        compiler_params=pltpu.CompilerParams(dimension_semantics=("parallel",)),
    )(hidden, ln_w.reshape(1, D), wqkv, wo, rel_bias)


def cross_attention_sublayer(hidden, enc, ln_w, wq, wkv, wo, n_heads, d_kv, eps):
    B, S, D = hidden.shape
    Senc = enc.shape[1]
    inner = n_heads * d_kv
    return pl.pallas_call(
        functools.partial(_cross_attn_kernel, n_heads=n_heads, d_kv=d_kv, eps=eps),
        out_shape=jax.ShapeDtypeStruct((B, S, D), jnp.float32),
        grid=(B,),
        in_specs=[
            pl.BlockSpec((1, S, D), lambda b: (b, 0, 0)),
            pl.BlockSpec((1, Senc, D), lambda b: (b, 0, 0)),
            pl.BlockSpec((1, D), lambda b: (0, 0)),
            pl.BlockSpec((D, inner), lambda b: (0, 0)),
            pl.BlockSpec((D, 2 * inner), lambda b: (0, 0)),
            pl.BlockSpec((inner, D), lambda b: (0, 0)),
        ],
        out_specs=pl.BlockSpec((1, S, D), lambda b: (b, 0, 0)),
        compiler_params=pltpu.CompilerParams(dimension_semantics=("parallel",)),
    )(hidden, enc, ln_w.reshape(1, D), wq, wkv, wo)


def ffn_sublayer(hidden2d, ln_w, wi, wo, eps):
    M, D = hidden2d.shape
    F = wi.shape[1]
    tm = _row_tile(M)
    tf = _ff_tile(F)
    return pl.pallas_call(
        functools.partial(_ffn_kernel, eps=eps),
        out_shape=jax.ShapeDtypeStruct((M, D), jnp.float32),
        grid=(M // tm, F // tf),
        in_specs=[
            pl.BlockSpec((tm, D), lambda i, f: (i, 0)),
            pl.BlockSpec((1, D), lambda i, f: (0, 0)),
            pl.BlockSpec((D, tf), lambda i, f: (0, f)),
            pl.BlockSpec((tf, D), lambda i, f: (f, 0)),
        ],
        out_specs=pl.BlockSpec((tm, D), lambda i, f: (i, 0)),
        scratch_shapes=[pltpu.VMEM((tm, D), jnp.float32)],
        compiler_params=pltpu.CompilerParams(
            dimension_semantics=("parallel", "arbitrary")),
    )(hidden2d, ln_w.reshape(1, D), wi, wo)


def rms_norm(x2d, weight, eps):
    M, D = x2d.shape
    tm = _row_tile(M)
    return pl.pallas_call(
        functools.partial(_rmsnorm_kernel, eps=eps),
        out_shape=jax.ShapeDtypeStruct((M, D), jnp.float32),
        grid=(M // tm,),
        in_specs=[
            pl.BlockSpec((tm, D), lambda i: (i, 0)),
            pl.BlockSpec((1, D), lambda i: (0, 0)),
        ],
        out_specs=pl.BlockSpec((tm, D), lambda i: (i, 0)),
        compiler_params=pltpu.CompilerParams(dimension_semantics=("parallel",)),
    )(x2d, weight.reshape(1, D))


# ----------------------------- JAX glue (T5 semantics) -----------------------------

def relative_position_bucket(relative_position, num_buckets=32, max_distance=128):
    # Decoder self-attention: bidirectional = False
    relative_buckets = jnp.zeros_like(relative_position)
    relative_position = -jnp.minimum(relative_position, 0)
    max_exact = num_buckets // 2
    is_small = relative_position < max_exact
    rp_safe = jnp.maximum(relative_position, 1).astype(jnp.float32)
    relative_position_if_large = max_exact + (
        jnp.log(rp_safe / max_exact)
        / jnp.log(max_distance / max_exact)
        * (num_buckets - max_exact)
    ).astype(jnp.int32)
    relative_position_if_large = jnp.minimum(relative_position_if_large, num_buckets - 1)
    relative_buckets = relative_buckets + jnp.where(
        is_small, relative_position, relative_position_if_large
    )
    return relative_buckets


def compute_relative_bias(rel_bias_weight, q_len, k_len, num_buckets, max_distance):
    """Relative position bias -> (H, q_len, k_len). Gather/bucketing stays in plain JAX."""
    context_position = jnp.arange(q_len)[:, None]
    memory_position = jnp.arange(k_len)[None, :]
    relative_position = memory_position - context_position            # (q, k)
    rp_bucket = relative_position_bucket(
        relative_position, num_buckets=num_buckets, max_distance=max_distance
    )
    values = rel_bias_weight[rp_bucket]                                # (q, k, H)
    return jnp.transpose(values, (2, 0, 1))                           # (H, q, k)


def t5_decoder_stack_forward(params, input_ids, encoder_hidden_states, cfg):
    D = cfg["d_model"]
    H = cfg["num_heads"]
    dk = cfg["d_kv"]
    eps = cfg["layer_norm_epsilon"]
    B, S = input_ids.shape

    # Embedding lookup (glue).  # TODO(synk): embedding gather kept in plain JAX.
    hidden = params["embed"][input_ids].astype(jnp.float32)            # (B, S, D)

    # Relative position bias computed once at layer 0 and reused (T5 semantics).
    # The causal mask (default all-ones attention_mask) and the zero encoder mask
    # are handled inside the attention kernels; no (B,H,S,Skv) bias is materialized.
    rel_bias = compute_relative_bias(
        params["rel_bias"], S, S,
        cfg["relative_attention_num_buckets"], cfg["relative_attention_max_distance"],
    )                                                                   # (H, S, S)

    enc = encoder_hidden_states.astype(jnp.float32)

    for lp in params["layers"]:
        # T5LayerSelfAttention (fused norm + QKV + attention + out-proj + residual).
        hidden = self_attention_sublayer(
            hidden, lp["sa_ln"], lp["sa_wqkv"], lp["sa_wo"], rel_bias, H, dk, eps)

        # T5LayerCrossAttention (fused norm + Q/KV + attention + out-proj + residual).
        hidden = cross_attention_sublayer(
            hidden, enc, lp["ca_ln"], lp["ca_wq"], lp["ca_wkv"], lp["ca_wo"], H, dk, eps)

        # T5LayerFF (fused norm + DenseReluDense + residual).
        hidden = ffn_sublayer(
            hidden.reshape(B * S, D), lp["ff_ln"], lp["ff_wi"], lp["ff_wo"], eps
        ).reshape(B, S, D)

    hidden = rms_norm(hidden.reshape(B * S, D), params["final_ln"], eps).reshape(B, S, D)
    # dropout layers are identity in eval mode
    return {"last_hidden_state": hidden}


# ----------------------------- deterministic param init -----------------------------

def init_params(key, cfg):
    D = cfg["d_model"]
    H = cfg["num_heads"]
    dk = cfg["d_kv"]
    F = cfg["d_ff"]
    V = cfg["vocab_size"]
    inner = H * dk
    params = {}

    key, k = jax.random.split(key)
    params["embed"] = jax.random.normal(k, (V, D), jnp.float32) * 0.02
    key, k = jax.random.split(key)
    params["rel_bias"] = (
        jax.random.normal(k, (cfg["relative_attention_num_buckets"], H), jnp.float32) * 0.02
    )

    def _w(key, shape):
        key, k = jax.random.split(key)
        return key, jax.random.normal(k, shape, jnp.float32) * 0.02

    layers = []
    for _ in range(cfg["num_layers"]):
        lp = {}
        # separate q/k/v generated then packed into fused projection weights
        key, sq = _w(key, (D, inner)); key, sk = _w(key, (D, inner)); key, sv = _w(key, (D, inner))
        lp["sa_wqkv"] = jnp.concatenate([sq, sk, sv], axis=1)          # (D, 3*inner)
        key, lp["sa_wo"] = _w(key, (inner, D))
        key, lp["ca_wq"] = _w(key, (D, inner))
        key, ck = _w(key, (D, inner)); key, cv = _w(key, (D, inner))
        lp["ca_wkv"] = jnp.concatenate([ck, cv], axis=1)               # (D, 2*inner)
        key, lp["ca_wo"] = _w(key, (inner, D))
        key, lp["ff_wi"] = _w(key, (D, F))
        key, lp["ff_wo"] = _w(key, (F, D))
        lp["sa_ln"] = jnp.ones((D,), jnp.float32)
        lp["ca_ln"] = jnp.ones((D,), jnp.float32)
        lp["ff_ln"] = jnp.ones((D,), jnp.float32)
        layers.append(lp)
    params["layers"] = layers
    params["final_ln"] = jnp.ones((D,), jnp.float32)
    return params


# ----------------------------- main -----------------------------

if __name__ == "__main__":
    cfg = dict(
        num_layers=2,
        d_model=32,
        num_heads=4,
        d_kv=8,
        d_ff=64,
        vocab_size=64,
        relative_attention_num_buckets=32,
        relative_attention_max_distance=128,
        layer_norm_epsilon=1e-6,
        dropout_rate=0.0,  # eval mode; dropout is identity
    )

    B, S, Senc = 2, 8, 8
    root = jax.random.PRNGKey(0)
    k_params, k_ids, k_enc = jax.random.split(root, 3)

    params = init_params(k_params, cfg)
    input_ids = jax.random.randint(k_ids, (B, S), 0, cfg["vocab_size"], dtype=jnp.int32)
    encoder_hidden_states = jax.random.normal(k_enc, (B, Senc, cfg["d_model"]), jnp.float32)

    forward = jax.jit(functools.partial(t5_decoder_stack_forward, cfg=cfg))
    out = forward(params, input_ids, encoder_hidden_states)
    jax.block_until_ready(out["last_hidden_state"])
    assert out["last_hidden_state"].shape == (B, S, cfg["d_model"])
    print("KERNEL_OK")
</pallas_src>

<mosaic_0001>
module attributes {stable_mosaic.version = 11 : i64} {
  func.func @_self_attn_kernel(%arg0: i32, %arg1: memref<1x8x32xf32, #tpu.memory_space<vmem>>, %arg2: memref<1x32xf32, #tpu.memory_space<vmem>>, %arg3: memref<32x96xf32, #tpu.memory_space<vmem>>, %arg4: memref<32x32xf32, #tpu.memory_space<vmem>>, %arg5: memref<4x8x8xf32, #tpu.memory_space<vmem>>, %arg6: memref<1x8x32xf32, #tpu.memory_space<vmem>>) attributes {dimension_semantics = [#tpu.dimension_semantics<parallel>], iteration_bounds = array<i64: 2>, scalar_prefetch = 0 : i64, scratch_operands = 0 : i64, tpu.core_type = #tpu.core_type<tc>, window_params = [{transform_indices = @transform_0, window_bounds = array<i64: 1, 8, 32>}, {pipeline_mode = #tpu.pipeline_mode<synchronous>, transform_indices = @transform_1, window_bounds = array<i64: 1, 32>}, {pipeline_mode = #tpu.pipeline_mode<synchronous>, transform_indices = @transform_2, window_bounds = array<i64: 32, 96>}, {pipeline_mode = #tpu.pipeline_mode<synchronous>, transform_indices = @transform_3, window_bounds = array<i64: 32, 32>}, {pipeline_mode = #tpu.pipeline_mode<synchronous>, transform_indices = @transform_4, window_bounds = array<i64: 4, 8, 8>}, {transform_indices = @transform_5, window_bounds = array<i64: 1, 8, 32>}]} {
    %c0 = arith.constant 0 : index
    %c0_0 = arith.constant 0 : index
    %c0_1 = arith.constant 0 : index
    %0 = vector.load %arg1[%c0, %c0_0, %c0_1] : memref<1x8x32xf32, #tpu.memory_space<vmem>>, vector<1x8x32xf32>
    %1 = vector.shape_cast %0 : vector<1x8x32xf32> to vector<8x32xf32>
    %c0_2 = arith.constant 0 : index
    %c0_3 = arith.constant 0 : index
    %2 = vector.load %arg2[%c0_2, %c0_3] : memref<1x32xf32, #tpu.memory_space<vmem>>, vector<1x32xf32>
    %3 = vector.shape_cast %2 : vector<1x32xf32> to vector<32xf32>
    %4 = arith.mulf %1, %1 : vector<8x32xf32>
    %cst = arith.constant dense<0.000000e+00> : vector<8xf32>
    %5 = vector.multi_reduction <add>, %4, %cst [1] : vector<8x32xf32> to vector<8xf32>
    %6 = vector.shape_cast %5 : vector<8xf32> to vector<8x1xf32>
    %cst_4 = arith.constant 3.200000e+01 : f32
    %7 = vector.broadcast %cst_4 : f32 to vector<8x1xf32>
    %8 = arith.divf %6, %7 : vector<8x1xf32>
    %cst_5 = arith.constant 9.99999997E-7 : f32
    %9 = vector.broadcast %cst_5 : f32 to vector<8x1xf32>
    %10 = arith.addf %8, %9 : vector<8x1xf32>
    %11 = math.rsqrt %10 : vector<8x1xf32>
    %12 = vector.broadcast %11 : vector<8x1xf32> to vector<8x32xf32>
    %13 = arith.mulf %1, %12 : vector<8x32xf32>
    %14 = vector.shape_cast %3 : vector<32xf32> to vector<1x32xf32>
    %15 = vector.broadcast %14 : vector<1x32xf32> to vector<8x32xf32>
    %16 = arith.mulf %13, %15 : vector<8x32xf32>
    %17 = arith.truncf %16 : vector<8x32xf32> to vector<8x32xbf16>
    %c0_6 = arith.constant 0 : index
    %c0_7 = arith.constant 0 : index
    %18 = vector.load %arg3[%c0_6, %c0_7] : memref<32x96xf32, #tpu.memory_space<vmem>>, vector<32x96xf32>
    %19 = arith.truncf %18 : vector<32x96xf32> to vector<32x96xbf16>
    %cst_8 = arith.constant dense<0.000000e+00> : vector<8x96xf32>
    %20 = tpu.matmul %17, %19, %cst_8 {dimension_numbers = #tpu.dot_dimension_numbers<[1], [0], [0], [1], [0, 0, 1, 1], [], []>} : vector<8x32xbf16>, vector<32x96xbf16>, vector<8x96xf32> -> vector<8x96xf32>
    %21 = tpu.iota {dimensions = array<i32: 0>} : vector<8x8xi32>
    %22 = tpu.iota {dimensions = array<i32: 1>} : vector<8x8xi32>
    %23 = arith.cmpi sle, %22, %21 : vector<8x8xi32>
    %cst_9 = arith.constant 0.000000e+00 : f32
    %cst_10 = arith.constant -3.40282347E+38 : f32
    %24 = vector.broadcast %cst_9 : f32 to vector<8x8xf32>
    %25 = vector.broadcast %cst_10 : f32 to vector<8x8xf32>
    %26 = arith.select %23, %24, %25 : vector<8x8xi1>, vector<8x8xf32>
    %c0_11 = arith.constant 0 : index
    %c0_12 = arith.constant 0 : index
    %27 = vector.load %arg4[%c0_11, %c0_12] : memref<32x32xf32, #tpu.memory_space<vmem>>, vector<32x32xf32>
    %28 = arith.truncf %27 : vector<32x32xf32> to vector<32x32xbf16>
    %cst_13 = arith.constant 0.000000e+00 : f32
    %29 = vector.broadcast %cst_13 : f32 to vector<8x32xf32>
    %30 = vector.extract_strided_slice %20 {offsets = [0, 0], sizes = [8, 8], strides = [1, 1]} : vector<8x96xf32> to vector<8x8xf32>
    %31 = arith.truncf %30 : vector<8x8xf32> to vector<8x8xbf16>
    %32 = vector.extract_strided_slice %20 {offsets = [0, 32], sizes = [8, 8], strides = [1, 1]} : vector<8x96xf32> to vector<8x8xf32>
    %33 = arith.truncf %32 : vector<8x8xf32> to vector<8x8xbf16>
    %34 = vector.extract_strided_slice %20 {offsets = [0, 64], sizes = [8, 8], strides = [1, 1]} : vector<8x96xf32> to vector<8x8xf32>
    %35 = arith.truncf %34 : vector<8x8xf32> to vector<8x8xbf16>
    %cst_14 = arith.constant dense<0.000000e+00> : vector<8x8xf32>
    %36 = tpu.matmul %31, %33, %cst_14 {dimension_numbers = #tpu.dot_dimension_numbers<[1], [1], [0], [0], [0, 0, 1, 0], [], []>} : vector<8x8xbf16>, vector<8x8xbf16>, vector<8x8xf32> -> vector<8x8xf32>
    %c0_15 = arith.constant 0 : index
    %c0_16 = arith.constant 0 : index
    %c0_17 = arith.constant 0 : index
    %37 = vector.load %arg5[%c0_15, %c0_16, %c0_17] : memref<4x8x8xf32, #tpu.memory_space<vmem>>, vector<1x8x8xf32>
    %38 = vector.shape_cast %37 : vector<1x8x8xf32> to vector<8x8xf32>
    %39 = arith.addf %36, %38 : vector<8x8xf32>
    %40 = arith.addf %39, %26 : vector<8x8xf32>
    %cst_18 = arith.constant dense<0xFF800000> : vector<8xf32>
    %41 = vector.multi_reduction <maximumf>, %40, %cst_18 [1] : vector<8x8xf32> to vector<8xf32>
    %42 = vector.shape_cast %41 : vector<8xf32> to vector<8x1xf32>
    %43 = vector.broadcast %42 : vector<8x1xf32> to vector<8x8xf32>
    %44 = arith.subf %40, %43 : vector<8x8xf32>
    %45 = math.exp %44 : vector<8x8xf32>
    %cst_19 = arith.constant dense<0.000000e+00> : vector<8xf32>
    %46 = vector.multi_reduction <add>, %45, %cst_19 [1] : vector<8x8xf32> to vector<8xf32>
    %47 = vector.shape_cast %46 : vector<8xf32> to vector<8x1xf32>
    %48 = tpu.reciprocal %47 {approx = true} : vector<8x1xf32> -> vector<8x1xf32>
    %49 = vector.broadcast %48 : vector<8x1xf32> to vector<8x8xf32>
    %50 = arith.mulf %45, %49 : vector<8x8xf32>
    %51 = arith.truncf %50 : vector<8x8xf32> to vector<8x8xbf16>
    %cst_20 = arith.constant dense<0.000000e+00> : vector<8x8xf32>
    %52 = tpu.matmul %51, %35, %cst_20 {dimension_numbers = #tpu.dot_dimension_numbers<[1], [0], [0], [1], [0, 0, 1, 1], [], []>} : vector<8x8xbf16>, vector<8x8xbf16>, vector<8x8xf32> -> vector<8x8xf32>
    %53 = arith.truncf %52 : vector<8x8xf32> to vector<8x8xbf16>
    %54 = vector.extract_strided_slice %28 {offsets = [0, 0], sizes = [8, 32], strides = [1, 1]} : vector<32x32xbf16> to vector<8x32xbf16>
    %cst_21 = arith.constant dense<0.000000e+00> : vector<8x32xf32>
    %55 = tpu.matmul %53, %54, %cst_21 {dimension_numbers = #tpu.dot_dimension_numbers<[1], [0], [0], [1], [0, 0, 1, 1], [], []>} : vector<8x8xbf16>, vector<8x32xbf16>, vector<8x32xf32> -> vector<8x32xf32>
    %56 = arith.addf %29, %55 : vector<8x32xf32>
    %57 = vector.extract_strided_slice %20 {offsets = [0, 8], sizes = [8, 8], strides = [1, 1]} : vector<8x96xf32> to vector<8x8xf32>
    %58 = arith.truncf %57 : vector<8x8xf32> to vector<8x8xbf16>
    %59 = vector.extract_strided_slice %20 {offsets = [0, 40], sizes = [8, 8], strides = [1, 1]} : vector<8x96xf32> to vector<8x8xf32>
    %60 = arith.truncf %59 : vector<8x8xf32> to vector<8x8xbf16>
    %61 = vector.extract_strided_slice %20 {offsets = [0, 72], sizes = [8, 8], strides = [1, 1]} : vector<8x96xf32> to vector<8x8xf32>
    %62 = arith.truncf %61 : vector<8x8xf32> to vector<8x8xbf16>
    %cst_22 = arith.constant dense<0.000000e+00> : vector<8x8xf32>
    %63 = tpu.matmul %58, %60, %cst_22 {dimension_numbers = #tpu.dot_dimension_numbers<[1], [1], [0], [0], [0, 0, 1, 0], [], []>} : vector<8x8xbf16>, vector<8x8xbf16>, vector<8x8xf32> -> vector<8x8xf32>
    %c1 = arith.constant 1 : index
    %c0_23 = arith.constant 0 : index
    %c0_24 = arith.constant 0 : index
    %64 = vector.load %arg5[%c1, %c0_23, %c0_24] : memref<4x8x8xf32, #tpu.memory_space<vmem>>, vector<1x8x8xf32>
    %65 = vector.shape_cast %64 : vector<1x8x8xf32> to vector<8x8xf32>
    %66 = arith.addf %63, %65 : vector<8x8xf32>
    %67 = arith.addf %66, %26 : vector<8x8xf32>
    %cst_25 = arith.constant dense<0xFF800000> : vector<8xf32>
    %68 = vector.multi_reduction <maximumf>, %67, %cst_25 [1] : vector<8x8xf32> to vector<8xf32>
    %69 = vector.shape_cast %68 : vector<8xf32> to vector<8x1xf32>
    %70 = vector.broadcast %69 : vector<8x1xf32> to vector<8x8xf32>
    %71 = arith.subf %67, %70 : vector<8x8xf32>
    %72 = math.exp %71 : vector<8x8xf32>
    %cst_26 = arith.constant dense<0.000000e+00> : vector<8xf32>
    %73 = vector.multi_reduction <add>, %72, %cst_26 [1] : vector<8x8xf32> to vector<8xf32>
    %74 = vector.shape_cast %73 : vector<8xf32> to vector<8x1xf32>
    %75 = tpu.reciprocal %74 {approx = true} : vector<8x1xf32> -> vector<8x1xf32>
    %76 = vector.broadcast %75 : vector<8x1xf32> to vector<8x8xf32>
    %77 = arith.mulf %72, %76 : vector<8x8xf32>
    %78 = arith.truncf %77 : vector<8x8xf32> to vector<8x8xbf16>
    %cst_27 = arith.constant dense<0.000000e+00> : vector<8x8xf32>
    %79 = tpu.matmul %78, %62, %cst_27 {dimension_numbers = #tpu.dot_dimension_numbers<[1], [0], [0], [1], [0, 0, 1, 1], [], []>} : vector<8x8xbf16>, vector<8x8xbf16>, vector<8x8xf32> -> vector<8x8xf32>
    %80 = arith.truncf %79 : vector<8x8xf32> to vector<8x8xbf16>
    %81 = vector.extract_strided_slice %28 {offsets = [8, 0], sizes = [8, 32], strides = [1, 1]} : vector<32x32xbf16> to vector<8x32xbf16>
    %cst_28 = arith.constant dense<0.000000e+00> : vector<8x32xf32>
    %82 = tpu.matmul %80, %81, %cst_28 {dimension_numbers = #tpu.dot_dimension_numbers<[1], [0], [0], [1], [0, 0, 1, 1], [], []>} : vector<8x8xbf16>, vector<8x32xbf16>, vector<8x32xf32> -> vector<8x32xf32>
    %83 = arith.addf %56, %82 : vector<8x32xf32>
    %84 = vector.extract_strided_slice %20 {offsets = [0, 16], sizes = [8, 8], strides = [1, 1]} : vector<8x96xf32> to vector<8x8xf32>
    %85 = arith.truncf %84 : vector<8x8xf32> to vector<8x8xbf16>
    %86 = vector.extract_strided_slice %20 {offsets = [0, 48], sizes = [8, 8], strides = [1, 1]} : vector<8x96xf32> to vector<8x8xf32>
    %87 = arith.truncf %86 : vector<8x8xf32> to vector<8x8xbf16>
    %88 = vector.extract_strided_slice %20 {offsets = [0, 80], sizes = [8, 8], strides = [1, 1]} : vector<8x96xf32> to vector<8x8xf32>
    %89 = arith.truncf %88 : vector<8x8xf32> to vector<8x8xbf16>
    %cst_29 = arith.constant dense<0.000000e+00> : vector<8x8xf32>
    %90 = tpu.matmul %85, %87, %cst_29 {dimension_numbers = #tpu.dot_dimension_numbers<[1], [1], [0], [0], [0, 0, 1, 0], [], []>} : vector<8x8xbf16>, vector<8x8xbf16>, vector<8x8xf32> -> vector<8x8xf32>
    %c2 = arith.constant 2 : index
    %c0_30 = arith.constant 0 : index
    %c0_31 = arith.constant 0 : index
    %91 = vector.load %arg5[%c2, %c0_30, %c0_31] : memref<4x8x8xf32, #tpu.memory_space<vmem>>, vector<1x8x8xf32>
    %92 = vector.shape_cast %91 : vector<1x8x8xf32> to vector<8x8xf32>
    %93 = arith.addf %90, %92 : vector<8x8xf32>
    %94 = arith.addf %93, %26 : vector<8x8xf32>
    %cst_32 = arith.constant dense<0xFF800000> : vector<8xf32>
    %95 = vector.multi_reduction <maximumf>, %94, %cst_32 [1] : vector<8x8xf32> to vector<8xf32>
    %96 = vector.shape_cast %95 : vector<8xf32> to vector<8x1xf32>
    %97 = vector.broadcast %96 : vector<8x1xf32> to vector<8x8xf32>
    %98 = arith.subf %94, %97 : vector<8x8xf32>
    %99 = math.exp %98 : vector<8x8xf32>
    %cst_33 = arith.constant dense<0.000000e+00> : vector<8xf32>
    %100 = vector.multi_reduction <add>, %99, %cst_33 [1] : vector<8x8xf32> to vector<8xf32>
    %101 = vector.shape_cast %100 : vector<8xf32> to vector<8x1xf32>
    %102 = tpu.reciprocal %101 {approx = true} : vector<8x1xf32> -> vector<8x1xf32>
    %103 = vector.broadcast %102 : vector<8x1xf32> to vector<8x8xf32>
    %104 = arith.mulf %99, %103 : vector<8x8xf32>
    %105 = arith.truncf %104 : vector<8x8xf32> to vector<8x8xbf16>
    %cst_34 = arith.constant dense<0.000000e+00> : vector<8x8xf32>
    %106 = tpu.matmul %105, %89, %cst_34 {dimension_numbers = #tpu.dot_dimension_numbers<[1], [0], [0], [1], [0, 0, 1, 1], [], []>} : vector<8x8xbf16>, vector<8x8xbf16>, vector<8x8xf32> -> vector<8x8xf32>
    %107 = arith.truncf %106 : vector<8x8xf32> to vector<8x8xbf16>
    %108 = vector.extract_strided_slice %28 {offsets = [16, 0], sizes = [8, 32], strides = [1, 1]} : vector<32x32xbf16> to vector<8x32xbf16>
    %cst_35 = arith.constant dense<0.000000e+00> : vector<8x32xf32>
    %109 = tpu.matmul %107, %108, %cst_35 {dimension_numbers = #tpu.dot_dimension_numbers<[1], [0], [0], [1], [0, 0, 1, 1], [], []>} : vector<8x8xbf16>, vector<8x32xbf16>, vector<8x32xf32> -> vector<8x32xf32>
    %110 = arith.addf %83, %109 : vector<8x32xf32>
    %111 = vector.extract_strided_slice %20 {offsets = [0, 24], sizes = [8, 8], strides = [1, 1]} : vector<8x96xf32> to vector<8x8xf32>
    %112 = arith.truncf %111 : vector<8x8xf32> to vector<8x8xbf16>
    %113 = vector.extract_strided_slice %20 {offsets = [0, 56], sizes = [8, 8], strides = [1, 1]} : vector<8x96xf32> to vector<8x8xf32>
    %114 = arith.truncf %113 : vector<8x8xf32> to vector<8x8xbf16>
    %115 = vector.extract_strided_slice %20 {offsets = [0, 88], sizes = [8, 8], strides = [1, 1]} : vector<8x96xf32> to vector<8x8xf32>
    %116 = arith.truncf %115 : vector<8x8xf32> to vector<8x8xbf16>
    %cst_36 = arith.constant dense<0.000000e+00> : vector<8x8xf32>
    %117 = tpu.matmul %112, %114, %cst_36 {dimension_numbers = #tpu.dot_dimension_numbers<[1], [1], [0], [0], [0, 0, 1, 0], [], []>} : vector<8x8xbf16>, vector<8x8xbf16>, vector<8x8xf32> -> vector<8x8xf32>
    %c3 = arith.constant 3 : index
    %c0_37 = arith.constant 0 : index
    %c0_38 = arith.constant 0 : index
    %118 = vector.load %arg5[%c3, %c0_37, %c0_38] : memref<4x8x8xf32, #tpu.memory_space<vmem>>, vector<1x8x8xf32>
    %119 = vector.shape_cast %118 : vector<1x8x8xf32> to vector<8x8xf32>
    %120 = arith.addf %117, %119 : vector<8x8xf32>
    %121 = arith.addf %120, %26 : vector<8x8xf32>
    %cst_39 = arith.constant dense<0xFF800000> : vector<8xf32>
    %122 = vector.multi_reduction <maximumf>, %121, %cst_39 [1] : vector<8x8xf32> to vector<8xf32>
    %123 = vector.shape_cast %122 : vector<8xf32> to vector<8x1xf32>
    %124 = vector.broadcast %123 : vector<8x1xf32> to vector<8x8xf32>
    %125 = arith.subf %121, %124 : vector<8x8xf32>
    %126 = math.exp %125 : vector<8x8xf32>
    %cst_40 = arith.constant dense<0.000000e+00> : vector<8xf32>
    %127 = vector.multi_reduction <add>, %126, %cst_40 [1] : vector<8x8xf32> to vector<8xf32>
    %128 = vector.shape_cast %127 : vector<8xf32> to vector<8x1xf32>
    %129 = tpu.reciprocal %128 {approx = true} : vector<8x1xf32> -> vector<8x1xf32>
    %130 = vector.broadcast %129 : vector<8x1xf32> to vector<8x8xf32>
    %131 = arith.mulf %126, %130 : vector<8x8xf32>
    %132 = arith.truncf %131 : vector<8x8xf32> to vector<8x8xbf16>
    %cst_41 = arith.constant dense<0.000000e+00> : vector<8x8xf32>
    %133 = tpu.matmul %132, %116, %cst_41 {dimension_numbers = #tpu.dot_dimension_numbers<[1], [0], [0], [1], [0, 0, 1, 1], [], []>} : vector<8x8xbf16>, vector<8x8xbf16>, vector<8x8xf32> -> vector<8x8xf32>
    %134 = arith.truncf %133 : vector<8x8xf32> to vector<8x8xbf16>
    %135 = vector.extract_strided_slice %28 {offsets = [24, 0], sizes = [8, 32], strides = [1, 1]} : vector<32x32xbf16> to vector<8x32xbf16>
    %cst_42 = arith.constant dense<0.000000e+00> : vector<8x32xf32>
    %136 = tpu.matmul %134, %135, %cst_42 {dimension_numbers = #tpu.dot_dimension_numbers<[1], [0], [0], [1], [0, 0, 1, 1], [], []>} : vector<8x8xbf16>, vector<8x32xbf16>, vector<8x32xf32> -> vector<8x32xf32>
    %137 = arith.addf %110, %136 : vector<8x32xf32>
    %138 = arith.addf %1, %137 : vector<8x32xf32>
    %c0_43 = arith.constant 0 : index
    %c0_44 = arith.constant 0 : index
    %c0_45 = arith.constant 0 : index
    %139 = vector.load %arg6[%c0_43, %c0_44, %c0_45] : memref<1x8x32xf32, #tpu.memory_space<vmem>>, vector<1x8x32xf32>
    %140 = vector.shape_cast %139 : vector<1x8x32xf32> to vector<8x32xf32>
    %141 = vector.shape_cast %138 : vector<8x32xf32> to vector<1x8x32xf32>
    tpu.vector_store %arg6[%c0_43, %c0_44, %c0_45], %141 {strides = array<i32>} : memref<1x8x32xf32, #tpu.memory_space<vmem>>, vector<1x8x32xf32>,
    return
  }
  func.func @transform_0(%arg0: i32) -> (i32, i32, i32) {
    %c0_i32 = arith.constant 0 : i32
    %c0_i32_0 = arith.constant 0 : i32
    %c0_i32_1 = arith.constant 0 : i32
    return %arg0, %c0_i32, %c0_i32_0 : i32, i32, i32
  }
  func.func @transform_1(%arg0: i32) -> (i32, i32) {
    %c0_i32 = arith.constant 0 : i32
    %c0_i32_0 = arith.constant 0 : i32
    %c0_i32_1 = arith.constant 0 : i32
    return %c0_i32, %c0_i32_0 : i32, i32
  }
  func.func @transform_2(%arg0: i32) -> (i32, i32) {
    %c0_i32 = arith.constant 0 : i32
    %c0_i32_0 = arith.constant 0 : i32
    %c0_i32_1 = arith.constant 0 : i32
    return %c0_i32, %c0_i32_0 : i32, i32
  }
  func.func @transform_3(%arg0: i32) -> (i32, i32) {
    %c0_i32 = arith.constant 0 : i32
    %c0_i32_0 = arith.constant 0 : i32
    %c0_i32_1 = arith.constant 0 : i32
    return %c0_i32, %c0_i32_0 : i32, i32
  }
  func.func @transform_4(%arg0: i32) -> (i32, i32, i32) {
    %c0_i32 = arith.constant 0 : i32
    %c0_i32_0 = arith.constant 0 : i32
    %c0_i32_1 = arith.constant 0 : i32
    %c0_i32_2 = arith.constant 0 : i32
    return %c0_i32, %c0_i32_0, %c0_i32_1 : i32, i32, i32
  }
  func.func @transform_5(%arg0: i32) -> (i32, i32, i32) {
    %c0_i32 = arith.constant 0 : i32
    %c0_i32_0 = arith.constant 0 : i32
    %c0_i32_1 = arith.constant 0 : i32
    return %arg0, %c0_i32, %c0_i32_0 : i32, i32, i32
  }
}

module attributes {stable_mosaic.version = 11 : i64} {
  func.func @_rmsnorm_kernel(%arg0: i32, %arg1: memref<16x32xf32, #tpu.memory_space<vmem>>, %arg2: memref<1x32xf32, #tpu.memory_space<vmem>>, %arg3: memref<16x32xf32, #tpu.memory_space<vmem>>) attributes {dimension_semantics = [#tpu.dimension_semantics<parallel>], iteration_bounds = array<i64: 1>, scalar_prefetch = 0 : i64, scratch_operands = 0 : i64, tpu.core_type = #tpu.core_type<tc>, window_params = [{transform_indices = @transform_0, window_bounds = array<i64: 16, 32>}, {pipeline_mode = #tpu.pipeline_mode<synchronous>, transform_indices = @transform_1, window_bounds = array<i64: 1, 32>}, {transform_indices = @transform_2, window_bounds = array<i64: 16, 32>}]} {
    %c0 = arith.constant 0 : index
    %c0_0 = arith.constant 0 : index
    %0 = vector.load %arg1[%c0, %c0_0] : memref<16x32xf32, #tpu.memory_space<vmem>>, vector<16x32xf32>
    %c0_1 = arith.constant 0 : index
    %c0_2 = arith.constant 0 : index
    %1 = vector.load %arg2[%c0_1, %c0_2] : memref<1x32xf32, #tpu.memory_space<vmem>>, vector<1x32xf32>
    %2 = arith.mulf %0, %0 : vector<16x32xf32>
    %cst = arith.constant dense<0.000000e+00> : vector<16xf32>
    %3 = vector.multi_reduction <add>, %2, %cst [1] : vector<16x32xf32> to vector<16xf32>
    %4 = vector.shape_cast %3 : vector<16xf32> to vector<16x1xf32>
    %cst_3 = arith.constant 3.200000e+01 : f32
    %5 = vector.broadcast %cst_3 : f32 to vector<16x1xf32>
    %6 = arith.divf %4, %5 : vector<16x1xf32>
    %cst_4 = arith.constant 9.99999997E-7 : f32
    %7 = vector.broadcast %cst_4 : f32 to vector<16x1xf32>
    %8 = arith.addf %6, %7 : vector<16x1xf32>
    %9 = math.rsqrt %8 : vector<16x1xf32>
    %10 = vector.broadcast %9 : vector<16x1xf32> to vector<16x32xf32>
    %11 = arith.mulf %0, %10 : vector<16x32xf32>
    %12 = vector.broadcast %1 : vector<1x32xf32> to vector<16x32xf32>
    %13 = arith.mulf %11, %12 : vector<16x32xf32>
    %c0_5 = arith.constant 0 : index
    %c0_6 = arith.constant 0 : index
    %14 = vector.load %arg3[%c0_5, %c0_6] : memref<16x32xf32, #tpu.memory_space<vmem>>, vector<16x32xf32>
    tpu.vector_store %arg3[%c0_5, %c0_6], %13 {strides = array<i32>} : memref<16x32xf32, #tpu.memory_space<vmem>>, vector<16x32xf32>,
    return
  }
  func.func @transform_0(%arg0: i32) -> (i32, i32) {
    %c0_i32 = arith.constant 0 : i32
    %c0_i32_0 = arith.constant 0 : i32
    return %arg0, %c0_i32 : i32, i32
  }
  func.func @transform_1(%arg0: i32) -> (i32, i32) {
    %c0_i32 = arith.constant 0 : i32
    %c0_i32_0 = arith.constant 0 : i32
    %c0_i32_1 = arith.constant 0 : i32
    return %c0_i32, %c0_i32_0 : i32, i32
  }
  func.func @transform_2(%arg0: i32) -> (i32, i32) {
    %c0_i32 = arith.constant 0 : i32
    %c0_i32_0 = arith.constant 0 : i32
    return %arg0, %c0_i32 : i32, i32
  }
}

module attributes {stable_mosaic.version = 11 : i64} {
  func.func @_cross_attn_kernel(%arg0: i32, %arg1: memref<1x8x32xf32, #tpu.memory_space<vmem>>, %arg2: memref<1x8x32xf32, #tpu.memory_space<vmem>>, %arg3: memref<1x32xf32, #tpu.memory_space<vmem>>, %arg4: memref<32x32xf32, #tpu.memory_space<vmem>>, %arg5: memref<32x64xf32, #tpu.memory_space<vmem>>, %arg6: memref<32x32xf32, #tpu.memory_space<vmem>>, %arg7: memref<1x8x32xf32, #tpu.memory_space<vmem>>) attributes {dimension_semantics = [#tpu.dimension_semantics<parallel>], iteration_bounds = array<i64: 2>, scalar_prefetch = 0 : i64, scratch_operands = 0 : i64, tpu.core_type = #tpu.core_type<tc>, window_params = [{transform_indices = @transform_0, window_bounds = array<i64: 1, 8, 32>}, {transform_indices = @transform_1, window_bounds = array<i64: 1, 8, 32>}, {pipeline_mode = #tpu.pipeline_mode<synchronous>, transform_indices = @transform_2, window_bounds = array<i64: 1, 32>}, {pipeline_mode = #tpu.pipeline_mode<synchronous>, transform_indices = @transform_3, window_bounds = array<i64: 32, 32>}, {pipeline_mode = #tpu.pipeline_mode<synchronous>, transform_indices = @transform_4, window_bounds = array<i64: 32, 64>}, {pipeline_mode = #tpu.pipeline_mode<synchronous>, transform_indices = @transform_5, window_bounds = array<i64: 32, 32>}, {transform_indices = @transform_6, window_bounds = array<i64: 1, 8, 32>}]} {
    %c0 = arith.constant 0 : index
    %c0_0 = arith.constant 0 : index
    %c0_1 = arith.constant 0 : index
    %0 = vector.load %arg1[%c0, %c0_0, %c0_1] : memref<1x8x32xf32, #tpu.memory_space<vmem>>, vector<1x8x32xf32>
    %1 = vector.shape_cast %0 : vector<1x8x32xf32> to vector<8x32xf32>
    %c0_2 = arith.constant 0 : index
    %c0_3 = arith.constant 0 : index
    %c0_4 = arith.constant 0 : index
    %2 = vector.load %arg2[%c0_2, %c0_3, %c0_4] : memref<1x8x32xf32, #tpu.memory_space<vmem>>, vector<1x8x32xf32>
    %3 = vector.shape_cast %2 : vector<1x8x32xf32> to vector<8x32xf32>
    %c0_5 = arith.constant 0 : index
    %c0_6 = arith.constant 0 : index
    %4 = vector.load %arg3[%c0_5, %c0_6] : memref<1x32xf32, #tpu.memory_space<vmem>>, vector<1x32xf32>
    %5 = vector.shape_cast %4 : vector<1x32xf32> to vector<32xf32>
    %6 = arith.mulf %1, %1 : vector<8x32xf32>
    %cst = arith.constant dense<0.000000e+00> : vector<8xf32>
    %7 = vector.multi_reduction <add>, %6, %cst [1] : vector<8x32xf32> to vector<8xf32>
    %8 = vector.shape_cast %7 : vector<8xf32> to vector<8x1xf32>
    %cst_7 = arith.constant 3.200000e+01 : f32
    %9 = vector.broadcast %cst_7 : f32 to vector<8x1xf32>
    %10 = arith.divf %8, %9 : vector<8x1xf32>
    %cst_8 = arith.constant 9.99999997E-7 : f32
    %11 = vector.broadcast %cst_8 : f32 to vector<8x1xf32>
    %12 = arith.addf %10, %11 : vector<8x1xf32>
    %13 = math.rsqrt %12 : vector<8x1xf32>
    %14 = vector.broadcast %13 : vector<8x1xf32> to vector<8x32xf32>
    %15 = arith.mulf %1, %14 : vector<8x32xf32>
    %16 = vector.shape_cast %5 : vector<32xf32> to vector<1x32xf32>
    %17 = vector.broadcast %16 : vector<1x32xf32> to vector<8x32xf32>
    %18 = arith.mulf %15, %17 : vector<8x32xf32>
    %19 = arith.truncf %18 : vector<8x32xf32> to vector<8x32xbf16>
    %c0_9 = arith.constant 0 : index
    %c0_10 = arith.constant 0 : index
    %20 = vector.load %arg4[%c0_9, %c0_10] : memref<32x32xf32, #tpu.memory_space<vmem>>, vector<32x32xf32>
    %21 = arith.truncf %20 : vector<32x32xf32> to vector<32x32xbf16>
    %cst_11 = arith.constant dense<0.000000e+00> : vector<8x32xf32>
    %22 = tpu.matmul %19, %21, %cst_11 {dimension_numbers = #tpu.dot_dimension_numbers<[1], [0], [0], [1], [0, 0, 1, 1], [], []>} : vector<8x32xbf16>, vector<32x32xbf16>, vector<8x32xf32> -> vector<8x32xf32>
    %23 = arith.truncf %3 : vector<8x32xf32> to vector<8x32xbf16>
    %c0_12 = arith.constant 0 : index
    %c0_13 = arith.constant 0 : index
    %24 = vector.load %arg5[%c0_12, %c0_13] : memref<32x64xf32, #tpu.memory_space<vmem>>, vector<32x64xf32>
    %25 = arith.truncf %24 : vector<32x64xf32> to vector<32x64xbf16>
    %cst_14 = arith.constant dense<0.000000e+00> : vector<8x64xf32>
    %26 = tpu.matmul %23, %25, %cst_14 {dimension_numbers = #tpu.dot_dimension_numbers<[1], [0], [0], [1], [0, 0, 1, 1], [], []>} : vector<8x32xbf16>, vector<32x64xbf16>, vector<8x64xf32> -> vector<8x64xf32>
    %c0_15 = arith.constant 0 : index
    %c0_16 = arith.constant 0 : index
    %27 = vector.load %arg6[%c0_15, %c0_16] : memref<32x32xf32, #tpu.memory_space<vmem>>, vector<32x32xf32>
    %28 = arith.truncf %27 : vector<32x32xf32> to vector<32x32xbf16>
    %cst_17 = arith.constant 0.000000e+00 : f32
    %29 = vector.broadcast %cst_17 : f32 to vector<8x32xf32>
    %30 = vector.extract_strided_slice %22 {offsets = [0, 0], sizes = [8, 8], strides = [1, 1]} : vector<8x32xf32> to vector<8x8xf32>
    %31 = arith.truncf %30 : vector<8x8xf32> to vector<8x8xbf16>
    %32 = vector.extract_strided_slice %26 {offsets = [0, 0], sizes = [8, 8], strides = [1, 1]} : vector<8x64xf32> to vector<8x8xf32>
    %33 = arith.truncf %32 : vector<8x8xf32> to vector<8x8xbf16>
    %34 = vector.extract_strided_slice %26 {offsets = [0, 32], sizes = [8, 8], strides = [1, 1]} : vector<8x64xf32> to vector<8x8xf32>
    %35 = arith.truncf %34 : vector<8x8xf32> to vector<8x8xbf16>
    %cst_18 = arith.constant dense<0.000000e+00> : vector<8x8xf32>
    %36 = tpu.matmul %31, %33, %cst_18 {dimension_numbers = #tpu.dot_dimension_numbers<[1], [1], [0], [0], [0, 0, 1, 0], [], []>} : vector<8x8xbf16>, vector<8x8xbf16>, vector<8x8xf32> -> vector<8x8xf32>
    %cst_19 = arith.constant dense<0xFF800000> : vector<8xf32>
    %37 = vector.multi_reduction <maximumf>, %36, %cst_19 [1] : vector<8x8xf32> to vector<8xf32>
    %38 = vector.shape_cast %37 : vector<8xf32> to vector<8x1xf32>
    %39 = vector.broadcast %38 : vector<8x1xf32> to vector<8x8xf32>
    %40 = arith.subf %36, %39 : vector<8x8xf32>
    %41 = math.exp %40 : vector<8x8xf32>
    %cst_20 = arith.constant dense<0.000000e+00> : vector<8xf32>
    %42 = vector.multi_reduction <add>, %41, %cst_20 [1] : vector<8x8xf32> to vector<8xf32>
    %43 = vector.shape_cast %42 : vector<8xf32> to vector<8x1xf32>
    %44 = tpu.reciprocal %43 {approx = true} : vector<8x1xf32> -> vector<8x1xf32>
    %45 = vector.broadcast %44 : vector<8x1xf32> to vector<8x8xf32>
    %46 = arith.mulf %41, %45 : vector<8x8xf32>
    %47 = arith.truncf %46 : vector<8x8xf32> to vector<8x8xbf16>
    %cst_21 = arith.constant dense<0.000000e+00> : vector<8x8xf32>
    %48 = tpu.matmul %47, %35, %cst_21 {dimension_numbers = #tpu.dot_dimension_numbers<[1], [0], [0], [1], [0, 0, 1, 1], [], []>} : vector<8x8xbf16>, vector<8x8xbf16>, vector<8x8xf32> -> vector<8x8xf32>
    %49 = arith.truncf %48 : vector<8x8xf32> to vector<8x8xbf16>
    %50 = vector.extract_strided_slice %28 {offsets = [0, 0], sizes = [8, 32], strides = [1, 1]} : vector<32x32xbf16> to vector<8x32xbf16>
    %cst_22 = arith.constant dense<0.000000e+00> : vector<8x32xf32>
    %51 = tpu.matmul %49, %50, %cst_22 {dimension_numbers = #tpu.dot_dimension_numbers<[1], [0], [0], [1], [0, 0, 1, 1], [], []>} : vector<8x8xbf16>, vector<8x32xbf16>, vector<8x32xf32> -> vector<8x32xf32>
    %52 = arith.addf %29, %51 : vector<8x32xf32>
    %53 = vector.extract_strided_slice %22 {offsets = [0, 8], sizes = [8, 8], strides = [1, 1]} : vector<8x32xf32> to vector<8x8xf32>
    %54 = arith.truncf %53 : vector<8x8xf32> to vector<8x8xbf16>
    %55 = vector.extract_strided_slice %26 {offsets = [0, 8], sizes = [8, 8], strides = [1, 1]} : vector<8x64xf32> to vector<8x8xf32>
    %56 = arith.truncf %55 : vector<8x8xf32> to vector<8x8xbf16>
    %57 = vector.extract_strided_slice %26 {offsets = [0, 40], sizes = [8, 8], strides = [1, 1]} : vector<8x64xf32> to vector<8x8xf32>
    %58 = arith.truncf %57 : vector<8x8xf32> to vector<8x8xbf16>
    %cst_23 = arith.constant dense<0.000000e+00> : vector<8x8xf32>
    %59 = tpu.matmul %54, %56, %cst_23 {dimension_numbers = #tpu.dot_dimension_numbers<[1], [1], [0], [0], [0, 0, 1, 0], [], []>} : vector<8x8xbf16>, vector<8x8xbf16>, vector<8x8xf32> -> vector<8x8xf32>
    %cst_24 = arith.constant dense<0xFF800000> : vector<8xf32>
    %60 = vector.multi_reduction <maximumf>, %59, %cst_24 [1] : vector<8x8xf32> to vector<8xf32>
    %61 = vector.shape_cast %60 : vector<8xf32> to vector<8x1xf32>
    %62 = vector.broadcast %61 : vector<8x1xf32> to vector<8x8xf32>
    %63 = arith.subf %59, %62 : vector<8x8xf32>
    %64 = math.exp %63 : vector<8x8xf32>
    %cst_25 = arith.constant dense<0.000000e+00> : vector<8xf32>
    %65 = vector.multi_reduction <add>, %64, %cst_25 [1] : vector<8x8xf32> to vector<8xf32>
    %66 = vector.shape_cast %65 : vector<8xf32> to vector<8x1xf32>
    %67 = tpu.reciprocal %66 {approx = true} : vector<8x1xf32> -> vector<8x1xf32>
    %68 = vector.broadcast %67 : vector<8x1xf32> to vector<8x8xf32>
    %69 = arith.mulf %64, %68 : vector<8x8xf32>
    %70 = arith.truncf %69 : vector<8x8xf32> to vector<8x8xbf16>
    %cst_26 = arith.constant dense<0.000000e+00> : vector<8x8xf32>
    %71 = tpu.matmul %70, %58, %cst_26 {dimension_numbers = #tpu.dot_dimension_numbers<[1], [0], [0], [1], [0, 0, 1, 1], [], []>} : vector<8x8xbf16>, vector<8x8xbf16>, vector<8x8xf32> -> vector<8x8xf32>
    %72 = arith.truncf %71 : vector<8x8xf32> to vector<8x8xbf16>
    %73 = vector.extract_strided_slice %28 {offsets = [8, 0], sizes = [8, 32], strides = [1, 1]} : vector<32x32xbf16> to vector<8x32xbf16>
    %cst_27 = arith.constant dense<0.000000e+00> : vector<8x32xf32>
    %74 = tpu.matmul %72, %73, %cst_27 {dimension_numbers = #tpu.dot_dimension_numbers<[1], [0], [0], [1], [0, 0, 1, 1], [], []>} : vector<8x8xbf16>, vector<8x32xbf16>, vector<8x32xf32> -> vector<8x32xf32>
    %75 = arith.addf %52, %74 : vector<8x32xf32>
    %76 = vector.extract_strided_slice %22 {offsets = [0, 16], sizes = [8, 8], strides = [1, 1]} : vector<8x32xf32> to vector<8x8xf32>
    %77 = arith.truncf %76 : vector<8x8xf32> to vector<8x8xbf16>
    %78 = vector.extract_strided_slice %26 {offsets = [0, 16], sizes = [8, 8], strides = [1, 1]} : vector<8x64xf32> to vector<8x8xf32>
    %79 = arith.truncf %78 : vector<8x8xf32> to vector<8x8xbf16>
    %80 = vector.extract_strided_slice %26 {offsets = [0, 48], sizes = [8, 8], strides = [1, 1]} : vector<8x64xf32> to vector<8x8xf32>
    %81 = arith.truncf %80 : vector<8x8xf32> to vector<8x8xbf16>
    %cst_28 = arith.constant dense<0.000000e+00> : vector<8x8xf32>
    %82 = tpu.matmul %77, %79, %cst_28 {dimension_numbers = #tpu.dot_dimension_numbers<[1], [1], [0], [0], [0, 0, 1, 0], [], []>} : vector<8x8xbf16>, vector<8x8xbf16>, vector<8x8xf32> -> vector<8x8xf32>
    %cst_29 = arith.constant dense<0xFF800000> : vector<8xf32>
    %83 = vector.multi_reduction <maximumf>, %82, %cst_29 [1] : vector<8x8xf32> to vector<8xf32>
    %84 = vector.shape_cast %83 : vector<8xf32> to vector<8x1xf32>
    %85 = vector.broadcast %84 : vector<8x1xf32> to vector<8x8xf32>
    %86 = arith.subf %82, %85 : vector<8x8xf32>
    %87 = math.exp %86 : vector<8x8xf32>
    %cst_30 = arith.constant dense<0.000000e+00> : vector<8xf32>
    %88 = vector.multi_reduction <add>, %87, %cst_30 [1] : vector<8x8xf32> to vector<8xf32>
    %89 = vector.shape_cast %88 : vector<8xf32> to vector<8x1xf32>
    %90 = tpu.reciprocal %89 {approx = true} : vector<8x1xf32> -> vector<8x1xf32>
    %91 = vector.broadcast %90 : vector<8x1xf32> to vector<8x8xf32>
    %92 = arith.mulf %87, %91 : vector<8x8xf32>
    %93 = arith.truncf %92 : vector<8x8xf32> to vector<8x8xbf16>
    %cst_31 = arith.constant dense<0.000000e+00> : vector<8x8xf32>
    %94 = tpu.matmul %93, %81, %cst_31 {dimension_numbers = #tpu.dot_dimension_numbers<[1], [0], [0], [1], [0, 0, 1, 1], [], []>} : vector<8x8xbf16>, vector<8x8xbf16>, vector<8x8xf32> -> vector<8x8xf32>
    %95 = arith.truncf %94 : vector<8x8xf32> to vector<8x8xbf16>
    %96 = vector.extract_strided_slice %28 {offsets = [16, 0], sizes = [8, 32], strides = [1, 1]} : vector<32x32xbf16> to vector<8x32xbf16>
    %cst_32 = arith.constant dense<0.000000e+00> : vector<8x32xf32>
    %97 = tpu.matmul %95, %96, %cst_32 {dimension_numbers = #tpu.dot_dimension_numbers<[1], [0], [0], [1], [0, 0, 1, 1], [], []>} : vector<8x8xbf16>, vector<8x32xbf16>, vector<8x32xf32> -> vector<8x32xf32>
    %98 = arith.addf %75, %97 : vector<8x32xf32>
    %99 = vector.extract_strided_slice %22 {offsets = [0, 24], sizes = [8, 8], strides = [1, 1]} : vector<8x32xf32> to vector<8x8xf32>
    %100 = arith.truncf %99 : vector<8x8xf32> to vector<8x8xbf16>
    %101 = vector.extract_strided_slice %26 {offsets = [0, 24], sizes = [8, 8], strides = [1, 1]} : vector<8x64xf32> to vector<8x8xf32>
    %102 = arith.truncf %101 : vector<8x8xf32> to vector<8x8xbf16>
    %103 = vector.extract_strided_slice %26 {offsets = [0, 56], sizes = [8, 8], strides = [1, 1]} : vector<8x64xf32> to vector<8x8xf32>
    %104 = arith.truncf %103 : vector<8x8xf32> to vector<8x8xbf16>
    %cst_33 = arith.constant dense<0.000000e+00> : vector<8x8xf32>
    %105 = tpu.matmul %100, %102, %cst_33 {dimension_numbers = #tpu.dot_dimension_numbers<[1], [1], [0], [0], [0, 0, 1, 0], [], []>} : vector<8x8xbf16>, vector<8x8xbf16>, vector<8x8xf32> -> vector<8x8xf32>
    %cst_34 = arith.constant dense<0xFF800000> : vector<8xf32>
    %106 = vector.multi_reduction <maximumf>, %105, %cst_34 [1] : vector<8x8xf32> to vector<8xf32>
    %107 = vector.shape_cast %106 : vector<8xf32> to vector<8x1xf32>
    %108 = vector.broadcast %107 : vector<8x1xf32> to vector<8x8xf32>
    %109 = arith.subf %105, %108 : vector<8x8xf32>
    %110 = math.exp %109 : vector<8x8xf32>
    %cst_35 = arith.constant dense<0.000000e+00> : vector<8xf32>
    %111 = vector.multi_reduction <add>, %110, %cst_35 [1] : vector<8x8xf32> to vector<8xf32>
    %112 = vector.shape_cast %111 : vector<8xf32> to vector<8x1xf32>
    %113 = tpu.reciprocal %112 {approx = true} : vector<8x1xf32> -> vector<8x1xf32>
    %114 = vector.broadcast %113 : vector<8x1xf32> to vector<8x8xf32>
    %115 = arith.mulf %110, %114 : vector<8x8xf32>
    %116 = arith.truncf %115 : vector<8x8xf32> to vector<8x8xbf16>
    %cst_36 = arith.constant dense<0.000000e+00> : vector<8x8xf32>
    %117 = tpu.matmul %116, %104, %cst_36 {dimension_numbers = #tpu.dot_dimension_numbers<[1], [0], [0], [1], [0, 0, 1, 1], [], []>} : vector<8x8xbf16>, vector<8x8xbf16>, vector<8x8xf32> -> vector<8x8xf32>
    %118 = arith.truncf %117 : vector<8x8xf32> to vector<8x8xbf16>
    %119 = vector.extract_strided_slice %28 {offsets = [24, 0], sizes = [8, 32], strides = [1, 1]} : vector<32x32xbf16> to vector<8x32xbf16>
    %cst_37 = arith.constant dense<0.000000e+00> : vector<8x32xf32>
    %120 = tpu.matmul %118, %119, %cst_37 {dimension_numbers = #tpu.dot_dimension_numbers<[1], [0], [0], [1], [0, 0, 1, 1], [], []>} : vector<8x8xbf16>, vector<8x32xbf16>, vector<8x32xf32> -> vector<8x32xf32>
    %121 = arith.addf %98, %120 : vector<8x32xf32>
    %122 = arith.addf %1, %121 : vector<8x32xf32>
    %c0_38 = arith.constant 0 : index
    %c0_39 = arith.constant 0 : index
    %c0_40 = arith.constant 0 : index
    %123 = vector.load %arg7[%c0_38, %c0_39, %c0_40] : memref<1x8x32xf32, #tpu.memory_space<vmem>>, vector<1x8x32xf32>
    %124 = vector.shape_cast %123 : vector<1x8x32xf32> to vector<8x32xf32>
    %125 = vector.shape_cast %122 : vector<8x32xf32> to vector<1x8x32xf32>
    tpu.vector_store %arg7[%c0_38, %c0_39, %c0_40], %125 {strides = array<i32>} : memref<1x8x32xf32, #tpu.memory_space<vmem>>, vector<1x8x32xf32>,
    return
  }
  func.func @transform_0(%arg0: i32) -> (i32, i32, i32) {
    %c0_i32 = arith.constant 0 : i32
    %c0_i32_0 = arith.constant 0 : i32
    %c0_i32_1 = arith.constant 0 : i32
    return %arg0, %c0_i32, %c0_i32_0 : i32, i32, i32
  }
  func.func @transform_1(%arg0: i32) -> (i32, i32, i32) {
    %c0_i32 = arith.constant 0 : i32
    %c0_i32_0 = arith.constant 0 : i32
    %c0_i32_1 = arith.constant 0 : i32
    return %arg0, %c0_i32, %c0_i32_0 : i32, i32, i32
  }
  func.func @transform_2(%arg0: i32) -> (i32, i32) {
    %c0_i32 = arith.constant 0 : i32
    %c0_i32_0 = arith.constant 0 : i32
    %c0_i32_1 = arith.constant 0 : i32
    return %c0_i32, %c0_i32_0 : i32, i32
  }
  func.func @transform_3(%arg0: i32) -> (i32, i32) {
    %c0_i32 = arith.constant 0 : i32
    %c0_i32_0 = arith.constant 0 : i32
    %c0_i32_1 = arith.constant 0 : i32
    return %c0_i32, %c0_i32_0 : i32, i32
  }
  func.func @transform_4(%arg0: i32) -> (i32, i32) {
    %c0_i32 = arith.constant 0 : i32
    %c0_i32_0 = arith.constant 0 : i32
    %c0_i32_1 = arith.constant 0 : i32
    return %c0_i32, %c0_i32_0 : i32, i32
  }
  func.func @transform_5(%arg0: i32) -> (i32, i32) {
    %c0_i32 = arith.constant 0 : i32
    %c0_i32_0 = arith.constant 0 : i32
    %c0_i32_1 = arith.constant 0 : i32
    return %c0_i32, %c0_i32_0 : i32, i32
  }
  func.func @transform_6(%arg0: i32) -> (i32, i32, i32) {
    %c0_i32 = arith.constant 0 : i32
    %c0_i32_0 = arith.constant 0 : i32
    %c0_i32_1 = arith.constant 0 : i32
    return %arg0, %c0_i32, %c0_i32_0 : i32, i32, i32
  }
}

module attributes {stable_mosaic.version = 11 : i64} {
  func.func @_ffn_kernel(%arg0: i32, %arg1: i32, %arg2: memref<16x32xf32, #tpu.memory_space<vmem>>, %arg3: memref<1x32xf32, #tpu.memory_space<vmem>>, %arg4: memref<32x64xf32, #tpu.memory_space<vmem>>, %arg5: memref<64x32xf32, #tpu.memory_space<vmem>>, %arg6: memref<16x32xf32, #tpu.memory_space<vmem>>, %arg7: memref<16x32xf32, #tpu.memory_space<vmem>>) attributes {dimension_semantics = [#tpu.dimension_semantics<parallel>, #tpu.dimension_semantics<arbitrary>], iteration_bounds = array<i64: 1, 1>, scalar_prefetch = 0 : i64, scratch_operands = 1 : i64, tpu.core_type = #tpu.core_type<tc>, window_params = [{transform_indices = @transform_0, window_bounds = array<i64: 16, 32>}, {pipeline_mode = #tpu.pipeline_mode<synchronous>, transform_indices = @transform_1, window_bounds = array<i64: 1, 32>}, {transform_indices = @transform_2, window_bounds = array<i64: 32, 64>}, {transform_indices = @transform_3, window_bounds = array<i64: 64, 32>}, {transform_indices = @transform_4, window_bounds = array<i64: 16, 32>}]} {
    %c0_i32 = arith.constant 0 : i32
    %0 = arith.cmpi eq, %arg1, %c0_i32 : i32
    %1 = arith.extui %0 : i1 to i32
    %c0_i32_0 = arith.constant 0 : i32
    %2 = arith.cmpi ne, %1, %c0_i32_0 : i32
    scf.if %2 {
      %cst_19 = arith.constant 0.000000e+00 : f32
      %33 = vector.broadcast %cst_19 : f32 to vector<16x32xf32>
      %c0_20 = arith.constant 0 : index
      %c0_21 = arith.constant 0 : index
      %34 = vector.load %arg7[%c0_20, %c0_21] : memref<16x32xf32, #tpu.memory_space<vmem>>, vector<16x32xf32>
      tpu.vector_store %arg7[%c0_20, %c0_21], %33 {strides = array<i32>} : memref<16x32xf32, #tpu.memory_space<vmem>>, vector<16x32xf32>,
    } else {
    }
    %c0 = arith.constant 0 : index
    %c0_1 = arith.constant 0 : index
    %3 = vector.load %arg2[%c0, %c0_1] : memref<16x32xf32, #tpu.memory_space<vmem>>, vector<16x32xf32>
    %c0_2 = arith.constant 0 : index
    %c0_3 = arith.constant 0 : index
    %4 = vector.load %arg3[%c0_2, %c0_3] : memref<1x32xf32, #tpu.memory_space<vmem>>, vector<1x32xf32>
    %5 = arith.mulf %3, %3 : vector<16x32xf32>
    %cst = arith.constant dense<0.000000e+00> : vector<16xf32>
    %6 = vector.multi_reduction <add>, %5, %cst [1] : vector<16x32xf32> to vector<16xf32>
    %7 = vector.shape_cast %6 : vector<16xf32> to vector<16x1xf32>
    %cst_4 = arith.constant 3.200000e+01 : f32
    %8 = vector.broadcast %cst_4 : f32 to vector<16x1xf32>
    %9 = arith.divf %7, %8 : vector<16x1xf32>
    %cst_5 = arith.constant 9.99999997E-7 : f32
    %10 = vector.broadcast %cst_5 : f32 to vector<16x1xf32>
    %11 = arith.addf %9, %10 : vector<16x1xf32>
    %12 = math.rsqrt %11 : vector<16x1xf32>
    %13 = vector.broadcast %12 : vector<16x1xf32> to vector<16x32xf32>
    %14 = arith.mulf %3, %13 : vector<16x32xf32>
    %15 = vector.broadcast %4 : vector<1x32xf32> to vector<16x32xf32>
    %16 = arith.mulf %14, %15 : vector<16x32xf32>
    %17 = arith.truncf %16 : vector<16x32xf32> to vector<16x32xbf16>
    %c0_6 = arith.constant 0 : index
    %c0_7 = arith.constant 0 : index
    %18 = vector.load %arg4[%c0_6, %c0_7] : memref<32x64xf32, #tpu.memory_space<vmem>>, vector<32x64xf32>
    %19 = arith.truncf %18 : vector<32x64xf32> to vector<32x64xbf16>
    %cst_8 = arith.constant dense<0.000000e+00> : vector<16x64xf32>
    %20 = tpu.matmul %17, %19, %cst_8 {dimension_numbers = #tpu.dot_dimension_numbers<[1], [0], [0], [1], [0, 0, 1, 1], [], []>} : vector<16x32xbf16>, vector<32x64xbf16>, vector<16x64xf32> -> vector<16x64xf32>
    %cst_9 = arith.constant 0.000000e+00 : f32
    %21 = vector.broadcast %cst_9 : f32 to vector<16x64xf32>
    %22 = arith.maximumf %20, %21 : vector<16x64xf32>
    %c0_10 = arith.constant 0 : index
    %c0_11 = arith.constant 0 : index
    %23 = vector.load %arg7[%c0_10, %c0_11] : memref<16x32xf32, #tpu.memory_space<vmem>>, vector<16x32xf32>
    %24 = arith.truncf %22 : vector<16x64xf32> to vector<16x64xbf16>
    %c0_12 = arith.constant 0 : index
    %c0_13 = arith.constant 0 : index
    %25 = vector.load %arg5[%c0_12, %c0_13] : memref<64x32xf32, #tpu.memory_space<vmem>>, vector<64x32xf32>
    %26 = arith.truncf %25 : vector<64x32xf32> to vector<64x32xbf16>
    %cst_14 = arith.constant dense<0.000000e+00> : vector<16x32xf32>
    %27 = tpu.matmul %24, %26, %cst_14 {dimension_numbers = #tpu.dot_dimension_numbers<[1], [0], [0], [1], [0, 0, 1, 1], [], []>} : vector<16x64xbf16>, vector<64x32xbf16>, vector<16x32xf32> -> vector<16x32xf32>
    %28 = arith.addf %23, %27 : vector<16x32xf32>
    %c0_15 = arith.constant 0 : index
    %c0_16 = arith.constant 0 : index
    %29 = vector.load %arg7[%c0_15, %c0_16] : memref<16x32xf32, #tpu.memory_space<vmem>>, vector<16x32xf32>
    tpu.vector_store %arg7[%c0_15, %c0_16], %28 {strides = array<i32>} : memref<16x32xf32, #tpu.memory_space<vmem>>, vector<16x32xf32>,
    %c0_i32_17 = arith.constant 0 : i32
    %30 = arith.cmpi eq, %arg1, %c0_i32_17 : i32
    %31 = arith.extui %30 : i1 to i32
    %c0_i32_18 = arith.constant 0 : i32
    %32 = arith.cmpi ne, %31, %c0_i32_18 : i32
    scf.if %32 {
      %c0_19 = arith.constant 0 : index
      %c0_20 = arith.constant 0 : index
      %33 = vector.load %arg7[%c0_19, %c0_20] : memref<16x32xf32, #tpu.memory_space<vmem>>, vector<16x32xf32>
      %34 = arith.addf %3, %33 : vector<16x32xf32>
      %c0_21 = arith.constant 0 : index
      %c0_22 = arith.constant 0 : index
      %35 = vector.load %arg6[%c0_21, %c0_22] : memref<16x32xf32, #tpu.memory_space<vmem>>, vector<16x32xf32>
      tpu.vector_store %arg6[%c0_21, %c0_22], %34 {strides = array<i32>} : memref<16x32xf32, #tpu.memory_space<vmem>>, vector<16x32xf32>,
    } else {
    }
    return
  }
  func.func @transform_0(%arg0: i32, %arg1: i32) -> (i32, i32) {
    %c0_i32 = arith.constant 0 : i32
    %c0_i32_0 = arith.constant 0 : i32
    return %arg0, %c0_i32 : i32, i32
  }
  func.func @transform_1(%arg0: i32, %arg1: i32) -> (i32, i32) {
    %c0_i32 = arith.constant 0 : i32
    %c0_i32_0 = arith.constant 0 : i32
    %c0_i32_1 = arith.constant 0 : i32
    return %c0_i32, %c0_i32_0 : i32, i32
  }
  func.func @transform_2(%arg0: i32, %arg1: i32) -> (i32, i32) {
    %c0_i32 = arith.constant 0 : i32
    %c0_i32_0 = arith.constant 0 : i32
    return %c0_i32, %arg1 : i32, i32
  }
  func.func @transform_3(%arg0: i32, %arg1: i32) -> (i32, i32) {
    %c0_i32 = arith.constant 0 : i32
    %c0_i32_0 = arith.constant 0 : i32
    return %arg1, %c0_i32 : i32, i32
  }
  func.func @transform_4(%arg0: i32, %arg1: i32) -> (i32, i32) {
    %c0_i32 = arith.constant 0 : i32
    %c0_i32_0 = arith.constant 0 : i32
    return %arg0, %c0_i32 : i32, i32
  }
}

</mosaic_0001>

<bundles_post_ra>
// kernel: t5_decoder_stack_forward.13
= control target key start
LH: loop header
LB: loop body
LE: loop exit
PB: predicated region body
PF: predicated region fallthrough
CT: control target
= control target key end

     0   :  { %vm17_vm0 = vcmask 261120   ;;  %s123_s0 = inlined_call_operand.vmem [shape: f32[16,32], index: 0, kind: input, shape index: {}]   ;;  %s124_s1 = inlined_call_operand.vmem [shape: f32[1,32], index: 1, kind: input, shape index: {}]   ;;  %s125_s2 = inlined_call_operand.hbm [shape: f32[16,32], index: 2, kind: output, shape index: {}]  }
   0x1   :  { %v12_v0 = vld [vmem:[%s123_s0] sm:$0xff]  ;;  %v13_v1 = vld [vmem:[%s123_s0 + $0x8] sm:$0xff] }
   0x2   :  { %7 = vsyncpa [#allocation3], 0  ;;  %v15_v2 = vmul.f32 %v12_v0, %v12_v0  ;;  %v16_v3 = vmul.f32 %v13_v1, %v13_v1  ;;  %v59_v13 = vld [vmem:[%s124_s1] ss:$0 sm:$0xff]  ;;  %s89_s14 = smov [#allocation2]  }
   0x3   :  { %s48_s15 = sshll.u32 %s89_s14, 4  ;;  %s49_s15 = int_to_ptr.vmem [resolvable:$true] %s48_s15 }
   0x4   :  { %v18_v4 = vsel %vm17_vm0, %v15_v2, 0.0  ;;  %v21_v5 = vsel %vm17_vm0, %v16_v3, 0.0  ;;  %s67_s16 = scalar_lea.vmem %s49_s15, 256  ;;  %p72_p1 = scmp.lt.s32.totalorder %s49_s15, %s49_s15 }
   0x5   :  { %19 = vadd.xlane.f32.xlu0 %v18_v4  ;;  %p68_p0 = scmp.ne.s32.totalorder %s49_s15, %s67_s16  ;;  %p73_p2 = scmp.lt.s32.totalorder %s67_s16, %s67_s16 }
   0x7   :  { %p74_p3 = por %p73_p2, %p72_p1 }
   0x9   :  { %22 = vadd.xlane.f32.xlu0 %v21_v5  ;;  %p75_p4 = pnand %p74_p3, %p68_p0 }
  0x8e   :  { %v20_v6 = vpop.xlane.xlu0 %19 }
  0x8f   :  { %v25_v7 = vmul.f32 0.03125, %v20_v6 }
  0x91   :  { %v27_v8 = vadd.f32 1e-06, %v25_v7 }
  0x92   :  { %v23_v9 = vpop.xlane.xlu0 %22 }
  0x93   :  { %63 = vrsqrt.f32 %v27_v8  ;;  %v26_v10 = vmul.f32 0.03125, %v23_v9 }
  0x95   :  { %v28_v11 = vadd.f32 1e-06, %v26_v10 }
  0x97   :  { %65 = vrsqrt.f32 %v28_v11 }
  0xa0   :  { %v64_v12 = vpop.eup %63 }
  0xa1   :  { %v31_v14 = vmul.f32 %v64_v12, %v12_v0 }
  0xa3   :  { %v39_v15 = vmul.f32 %v59_v13, %v31_v14 }
  0xa4   :  { %v66_v16 = vpop.eup %65 }
  0xa5   :  { %v32_v17 = vmul.f32 %v66_v16, %v13_v1  ;;  %41 = vst.msk [vmem:[#allocation2] sm:$0xff] %vm17_vm0, %v39_v15 }
  0xa7   :  { %v40_v18 = vmul.f32 %v59_v13, %v32_v17 }
  0xa9   :  { %42 = vst.msk [vmem:[#allocation2 + $0x8] sm:$0xff] %vm17_vm0, %v40_v18 }
  0xaa   :  { %78 = shalt.err (!%p75_p4)
}
  0xab   :  { %s90_s1 = smov 128   ;;  %s91_s17 = smov 8  }
  0xac   :  { %54 = dma.vmem_to_hbm [thread:$0]  %s49_s15, 256, %s125_s2, [#allocation3], %s90_s1, %s90_s1, %s91_s17  }
  0xad   :  { %87 = dma.done.wait [#allocation3], 256  }
  0xae   :  { %88 = vsyncadd [#allocation3], 4294967040 }
  0xaf   :  { %58 = vsyncpa [#allocation3], 1 }

// kernel: t5_decoder_stack_forward.9
= control target key start
LH: loop header
LB: loop body
LE: loop exit
PB: predicated region body
PF: predicated region fallthrough
CT: control target
= control target key end

     0   :  { %vm22_vm0 = vcmask 261120   ;;  %v221_v6 = vmov 0.0   ;;  %vm222_vm1 = vmmov 0   ;;  %vm122_vm2 = vcmask 523264   ;;  %s320_s0 = inlined_call_operand.vmem [shape: f32[16,32], index: 0, kind: input, shape index: {}]   ;;  %s321_s2 = inlined_call_operand.vmem [shape: f32[32,64], index: 2, kind: input, shape index: {}]   ;;  %s322_s3 = inlined_call_operand.vmem [shape: f32[64,32], index: 3, kind: input, shape index: {}]   ;;  %s323_s1 = inlined_call_operand.vmem [shape: f32[1,32], index: 1, kind: input, shape index: {}]   ;;  %s324_s4 = inlined_call_operand.vmem [shape: f32[16,32], index: 4, kind: output, shape index: {}]  }
   0x1   :  { %v251_v0 = vld [vmem:[%s320_s0] sm:$0xff]  ;;  %v256_v1 = vld [vmem:[%s320_s0 + $0x8] sm:$0xff]  ;;  %195 = vmatprep.subr.bf16.mxu0 %v221_v6  ;;  %23 = vst.msk [vmem:[#allocation2] sm:$0xff] %vm22_vm0, %v221_v6  ;;  %24 = vst.msk [vmem:[#allocation2 + $0x8] sm:$0xff] %vm22_vm0, %v221_v6  ;;  %199 = vmatprep.mubr.msk.bf16.mxu0 %vm222_vm1, %v221_v6 }
   0x2   :  { %v28_v2 = vmul.f32 %v251_v0, %v251_v0  ;;  %v29_v3 = vmul.f32 %v256_v1, %v256_v1  ;;  %v57_v7 = vld [vmem:[%s321_s2 + $0x10] sm:$0xff]  ;;  %v58_v8 = vld [vmem:[%s321_s2 + $0x18] sm:$0xff]  ;;  %v55_v9 = vld [vmem:[%s321_s2] sm:$0xff]  ;;  %203 = vmatprep.subr.bf16.mxu1 %v221_v6  ;;  %211 = vmatprep.mubr.msk.bf16.mxu1 %vm222_vm1, %v221_v6 }
   0x3   :  { %v60_v10 = vpack.c.bf16 %v58_v8, %v57_v7  ;;  %v56_v11 = vld [vmem:[%s321_s2 + $0x8] sm:$0xff]  ;;  %v116_v13 = vld [vmem:[%s322_s3 + $0x30] sm:$0xff]  ;;  %v117_v14 = vld [vmem:[%s322_s3 + $0x38] sm:$0xff] }
   0x4   :  { %v31_v4 = vsel %vm22_vm0, %v28_v2, 0.0  ;;  %v34_v5 = vsel %vm22_vm0, %v29_v3, 0.0  ;;  %v59_v12 = vpack.c.bf16 %v56_v11, %v55_v9  ;;  %v114_v15 = vld [vmem:[%s322_s3 + $0x20] sm:$0xff]  ;;  %v121_v16 = vpack.c.bf16 %v117_v14, %v116_v13  ;;  %v115_v17 = vld [vmem:[%s322_s3 + $0x28] sm:$0xff]  ;;  %v112_v33 = vld [vmem:[%s322_s3 + $0x10] sm:$0xff] }
   0x5   :  { %32 = vadd.xlane.f32.xlu0 %v31_v4  ;;  %196 = vmatpush3.bf16.msra.mxu0 %v60_v10  ;;  %v120_v18 = vpack.c.bf16 %v115_v17, %v114_v15  ;;  %v184_v28 = vld [vmem:[%s323_s1] ss:$0 sm:$0xff]  ;;  %v113_v34 = vld [vmem:[%s322_s3 + $0x18] sm:$0xff]  ;;  %v111_v37 = vld [vmem:[%s322_s3 + $0x8] sm:$0xff] }
   0x6   :  { %197 = vmatprep.subr.bf16.mxu0 %v221_v6  ;;  %204 = vmatpush3.bf16.msra.mxu1 %v121_v16  ;;  %v119_v35 = vpack.c.bf16 %v113_v34, %v112_v33  ;;  %v110_v36 = vld [vmem:[%s322_s3] sm:$0xff] }
   0x7   :  { %205 = vmatprep.subr.bf16.mxu1 %v221_v6  ;;  %v118_v38 = vpack.c.bf16 %v111_v37, %v110_v36 }
   0x8   :  { %v107_v46 = vld [vmem:[#allocation2] sm:$0xff]  ;;  %v108_v50 = vld [vmem:[#allocation2 + $0x8] sm:$0xff] }
   0x9   :  { %35 = vadd.xlane.f32.xlu0 %v34_v5  ;;  %198 = vmatpush3.bf16.msra.mxu0 %v59_v12 }
   0xa   :  { %206 = vmatpush3.bf16.msra.mxu1 %v120_v18 }
   0xb   :  { %207 = vmatprep.subr.bf16.mxu1 %v221_v6 }
   0xe   :  { %208 = vmatpush3.bf16.msra.mxu1 %v119_v35 }
   0xf   :  { %209 = vmatprep.subr.bf16.mxu1 %v221_v6 }
  0x12   :  { %210 = vmatpush3.bf16.msra.mxu1 %v118_v38 }
  0x8e   :  { %v33_v19 = vpop.xlane.xlu0 %32 }
  0x8f   :  { %v38_v20 = vmul.f32 0.03125, %v33_v19 }
  0x91   :  { %v40_v21 = vadd.f32 1e-06, %v38_v20 }
  0x92   :  { %v36_v22 = vpop.xlane.xlu0 %35 }
  0x93   :  { %217 = vrsqrt.f32 %v40_v21  ;;  %v39_v23 = vmul.f32 0.03125, %v36_v22 }
  0x95   :  { %v41_v24 = vadd.f32 1e-06, %v39_v23 }
  0x97   :  { %219 = vrsqrt.f32 %v41_v24 }
  0xa0   :  { %v218_v25 = vpop.eup %217 }
  0xa1   :  { %v44_v26 = vmul.f32 %v218_v25, %v251_v0 }
  0xa3   :  { %v52_v30 = vmul.f32 %v184_v28, %v44_v26 }
  0xa4   :  { %v220_v27 = vpop.eup %219 }
  0xa5   :  { %v45_v29 = vmul.f32 %v220_v27, %v256_v1 }
  0xa7   :  { %v53_v31 = vmul.f32 %v184_v28, %v45_v29 }
  0xa9   :  { %v54_v32 = vpack.c.bf16 %v53_v31, %v52_v30 }
  0xab   :  { %200 = vmatmul.mubr.msk.bf16.vlgmr.msra.gmra.mxu0 %vm22_vm0, %v54_v32 }
 0x16b   :  { %v98_v39 = vpop.f32.mrf.mxu0 }
 0x16c   :  { %v105_v42 = vmax.f32 %v98_v39, 0.0 }
 0x16d   :  { %v201_v40 = vpop.f32.mrf.mxu0 }
 0x16f   :  { %v101_v41 = vpop.f32.mrf.mxu0 }
 0x170   :  { %v106_v43 = vmax.f32 %v101_v41, 0.0 }
 0x171   :  { %v202_v44 = vpop.f32.mrf.mxu0 }
 0x172   :  { %v109_v45 = vpack.c.bf16 %v106_v43, %v105_v42 }
 0x174   :  { %212 = vmatmul.mubr.msk.bf16.vlgmr.msra.gmra.mxu1 %vm122_vm2, %v109_v45 }
 0x234   :  { %v160_v47 = vpop.f32.mrf.mxu1 }
 0x235   :  { %v167_v48 = vadd.f32 %v160_v47, %v107_v46 }
 0x236   :  { %v213_v49 = vpop.f32.mrf.mxu1 }
 0x237   :  { %169 = vst.msk [vmem:[#allocation2] sm:$0xff] %vm22_vm0, %v167_v48 }
 0x238   :  { %v163_v51 = vpop.f32.mrf.mxu1 }
 0x239   :  { %v168_v52 = vadd.f32 %v163_v51, %v108_v50 }
 0x23a   :  { %v214_v53 = vpop.f32.mrf.mxu1 }
 0x23b   :  { %170 = vst.msk [vmem:[#allocation2 + $0x8] sm:$0xff] %vm22_vm0, %v168_v52 }
 0x23e   :  { %v174_v54 = vld [vmem:[#allocation2] sm:$0xff] }
 0x23f   :  { %v176_v55 = vadd.f32 %v174_v54, %v251_v0 }
 0x241   :  { %178 = vst.msk [vmem:[%s324_s4] sm:$0xff] %vm22_vm0, %v176_v55 }
 0x242   :  { %v175_v56 = vld [vmem:[#allocation2 + $0x8] sm:$0xff] }
 0x243   :  { %v177_v57 = vadd.f32 %v175_v56, %v256_v1 }
 0x245   :  { %179 = vst.msk [vmem:[%s324_s4 + $0x8] sm:$0xff] %vm22_vm0, %v177_v57 }

// kernel: t5_decoder_stack_forward.7
= control target key start
LH: loop header
LB: loop body
LE: loop exit
PB: predicated region body
PF: predicated region fallthrough
CT: control target
= control target key end

     0   :  { %s1229_s18 = smov 0   ;;  %s1396_s0 = inlined_call_operand.vmem [shape: f32[2,8,32], index: 0, kind: input, shape index: {}]   ;;  %s1397_s1 = inlined_call_operand.vmem [shape: f32[1,32], index: 1, kind: input, shape index: {}]   ;;  %s1398_s2 = inlined_call_operand.vmem [shape: f32[32,96], index: 2, kind: input, shape index: {}]   ;;  %s1399_s3 = inlined_call_operand.vmem [shape: f32[32,32], index: 3, kind: input, shape index: {}]   ;;  %s1400_s4 = inlined_call_operand.vmem [shape: f32[4,8,8], index: 4, kind: input, shape index: {}]   ;;  %s1401_s5 = inlined_call_operand.vmem [shape: f32[2,8,32], index: 5, kind: output, shape index: {}]  }
   0x1 LB: > { %s1004_s19 = sadd.s32 4294967295, %s1183_s18   ;;  %p1008_p0 = scmp.ge.s32.totalorder %s1183_s18, 1  ;;  %s1183_s18 = sphi %s1229_s18, %s15_s18  }
   0x2   : > { %p186_p1 = scmp.lt.s32.totalorder %s1183_s18, 3 }
   0x4   : > { %p187_p2 = pnand %p1008_p0, %p186_p1 }
   0x5   : > { %p212_p3 = scmp.lt.s32.totalorder (!%p187_p2), %s1004_s19, 1  ;;  %s1187_s9 = smov (!%p187_p2), 88  }
   0x6   : > { %190 = sbr.rel (%p187_p2) target bundleno = 2644 (0xa54), region = 40  ;;  %s1188_s10 = smov (!%p187_p2), 96  }
   0x7   : > { %s1189_s11 = smov (!%p187_p2), 120   ;;  %s1191_s16 = smov (!%p187_p2), 56  }
   0x8   : > { %s1192_s17 = smov (!%p187_p2), 64   ;;  %s1193_s21 = smov (!%p187_p2), 80  }
   0x9   : > { %s1194_s22 = smov (!%p187_p2), 112   ;;  %s1195_s29 = smov (!%p187_p2), 72  }
   0xa   : > { %s1196_s30 = smov (!%p187_p2), 104   ;;  %s1197_s6 = smov (!%p187_p2), 48  }
   0xb   : > { %s1403_s19 = smov (!%p212_p3, %s1004_s19), 1  ;;  %vm224_vm0 = vcmask 261120   ;;  %v243_v3 = vld [vmem:[%s1398_s2 + $0x10] sm:$0xff]  ;;  %v244_v4 = vld [vmem:[%s1398_s2 + $0x18] sm:$0xff]  ;;  %v241_v5 = vld [vmem:[%s1398_s2] sm:$0xff]  ;;  %v1185_v6 = vmov 0.0   ;;  %v290_v28 = vlaneseq }
   0xc   : > { %s1009_s20 = sshll.u32 %s1403_s19, 3  ;;  %1057 = vmatprep.subr.bf16.mxu0 %v1185_v6  ;;  %v246_v7 = vpack.c.bf16 %v244_v4, %v243_v3  ;;  %v242_v8 = vld [vmem:[%s1398_s2 + $0x8] sm:$0xff]  ;;  %vm1186_vm1 = vmmov 0   ;;  %1065 = vmatprep.subr.bf16.mxu1 %v1185_v6  ;;  %v1011_v14 = vld [vmem:[%s1397_s1] ss:$0 sm:$0xff]  ;;  %vm307_vm2 = vcmask 64512  }
   0xd   : > { %s215_s23 = scalar_lea.vmem %s1396_s0, %s1009_s20  ;;  %1061 = vmatprep.mubr.msk.bf16.mxu0 %vm1186_vm1, %v1185_v6  ;;  %1067 = vmatprep.mubr.msk.bf16.mxu1 %vm1186_vm1, %v1185_v6  ;;  %v245_v9 = vpack.c.bf16 %v242_v8, %v241_v5  ;;  %v291_v29 = vshrl.u32 %v290_v28, 7  ;;  %v293_v30 = vand.u32 127, %v290_v28  ;;  %v303_v31 = vld [vmem:[%s1400_s4] sm:$0xff]  ;;  %v1190_v33 = vmov -3.4028235e+38   ;;  %v1015_v41 = vld [vmem:[%s1400_s4 + $0x8] sm:$0xff] }
   0xe   : > { %v1245_v0 = vld [vmem:[%s215_s23] sm:$0xff]  ;;  %1058 = vmatpush3.bf16.msra.mxu0 %v246_v7  ;;  %vm372_vm4 = vcmask 1043456   ;;  %s1198_s13 = smov 40  }
   0xf   : > { %v223_v1 = vmul.f32 %v1245_v0, %v1245_v0  ;;  %1059 = vmatprep.subr.bf16.mxu0 %v1185_v6  ;;  %vm294_vm3 = vcmp.le.s32.totalorder %v293_v30, %v291_v29 }
  0x10   : > { %v1296_v34 = vsel %vm294_vm3, 0.0, %v1190_v33 }
  0x11   : > { %v225_v2 = vsel %vm224_vm0, %v223_v1, 0.0 }
  0x12   : > { %226 = vadd.xlane.f32.xlu0 %v225_v2  ;;  %1060 = vmatpush3.bf16.msra.mxu0 %v245_v9  ;;  %v296_v9 = vld [vmem:[%s1399_s3] sm:$0xff] }
  0x13   : > { %1071 = vmatprep.subr.bf16.mxu0 %v1185_v6 }
  0x9b   : > { %v227_v10 = vpop.xlane.xlu0 %226 }
  0x9c   : > { %v229_v11 = vmul.f32 0.03125, %v227_v10  ;;  %v297_v10 = vld [vmem:[%s1399_s3 + $0x8] sm:$0xff] }
  0x9e   : > { %v230_v12 = vadd.f32 1e-06, %v229_v11  ;;  %v300_v11 = vpack.c.bf16 %v297_v10, %v296_v9 }
  0xa0   : > { %1159 = vrsqrt.f32 %v230_v12  ;;  %v583_v12 = vsel %vm372_vm4, %v300_v11, 0 }
  0xad   : > { %v1160_v13 = vpop.eup %1159 }
  0xae   : > { %v232_v15 = vmul.f32 %v1160_v13, %v1245_v0  ;;  %v532_v13 = vrot.slane %v300_v11, 4 }
  0xb0   : > { %v239_v16 = vmul.f32 %v1011_v14, %v232_v15  ;;  %v537_v14 = vsel %vm372_vm4, %v532_v13, 0 }
  0xb2   : > { %v240_v17 = vpack.c.bf16 %v239_v16, %v239_v16 }
  0xb4   : > { %1062 = vmatmul.mubr.msk.bf16.vlgmr.msra.gmra.mxu0 %vm224_vm0, %v240_v17 }
  0xb5   : > { %1073 = vmatprep.mubr.msk.bf16.mxu0 %vm1186_vm1, %v1185_v6 }
 0x174   : > { %v284_v18 = vpop.f32.mrf.mxu0 }
 0x175   : > { %v1277_v19 = vpack.c.bf16 %v284_v18, %v284_v18 }
 0x176   : > { %v1063_v20 = vpop.f32.mrf.mxu0 }
 0x177   : > { %421 = vrot.lane.b32.xlu1 %v1277_v19, %s1187_s9  ;;  %305 = vrot.lane.b32.xlu0 %v1277_v19, %s1188_s10 }
 0x178   : > { %v287_v21 = vpop.f32.mrf.mxu0 }
 0x17a   : > { %v1064_v22 = vpop.f32.mrf.mxu0 }
 0x17b   : > { %419 = vrot.lane.b32.xlu1 %v1277_v19, %s1189_s11 }
 0x1e9   : > { %v306_v23 = vpop.permute.xlu0 %305  ;;  %v422_v25 = vpop.permute.xlu1 %421 }
 0x1ea   : > { %v312_v24 = vsel %vm307_vm2, %v306_v23, 0  ;;  %v427_v26 = vsel %vm307_vm2, %v422_v25, 0 }
 0x1eb   : > { %1066 = vmatpush3.bf16.xpose.msra.mxu1 %v312_v24 }
 0x1ec   : > { %1077 = vmatprep.subr.bf16.mxu1 %v1185_v6 }
 0x1ed   : > { %v420_v27 = vpop.permute.xlu1 %419 }
 0x1f2   : > { %1068 = vmatmul.mubr.msk.bf16.vlgmr.msra.gmra.mxu1 %vm307_vm2, %v1277_v19 }
 0x1f3   : > { %1078 = vmatpush3.bf16.xpose.msra.mxu1 %v427_v26  ;;  %1079 = vmatprep.mubr.msk.bf16.mxu1 %vm1186_vm1, %v1185_v6 }
 0x1f4   : > { %1089 = vmatprep.subr.bf16.mxu1 %v1185_v6 }
 0x1fa   : > { %1080 = vmatmul.mubr.msk.bf16.vlgmr.msra.gmra.mxu1 %vm307_vm2, %v420_v27 }
 0x1fb   : > { %1091 = vmatprep.mubr.msk.bf16.mxu1 %vm1186_vm1, %v1185_v6  ;;  %1090 = vmatpush3.bf16.msra.mxu1 %v537_v14 }
 0x1fc   : > { %1101 = vmatprep.subr.bf16.mxu1 %v1185_v6 }
 0x2b2   : > { %v348_v32 = vpop.f32.mrf.mxu1 }
 0x2b3   : > { %v349_v35 = vadd.f32 %v348_v32, %v303_v31 }
 0x2b4   : > { %v1069_v36 = vpop.f32.mrf.mxu1 }
 0x2b5   : > { %v354_v37 = vadd.f32 %v349_v35, %v1296_v34 }
 0x2b6   : > { %v351_v38 = vpop.f32.mrf.mxu1 }
 0x2b7   : > { %v355_v39 = vsel %vm307_vm2, %v354_v37, -inf }
 0x2b8   : > { %356 = vmax.xlane.f32.xlu1 %v355_v39  ;;  %v1070_v40 = vpop.f32.mrf.mxu1  ;;  %v1020_v39 = vld [vmem:[%s1400_s4 + $0x10] sm:$0xff] }
 0x2ba   : > { %v463_v42 = vpop.f32.mrf.mxu1 }
 0x2bb   : > { %v464_v43 = vadd.f32 %v1015_v41, %v463_v42 }
 0x2bc   : > { %v1081_v44 = vpop.f32.mrf.mxu1 }
 0x2bd   : > { %v469_v45 = vadd.f32 %v464_v43, %v1296_v34 }
 0x2be   : > { %v466_v46 = vpop.f32.mrf.mxu1 }
 0x2bf   : > { %v470_v47 = vsel %vm307_vm2, %v469_v45, -inf }
 0x2c0   : > { %471 = vmax.xlane.f32.xlu0 %v470_v47  ;;  %v1082_v48 = vpop.f32.mrf.mxu1 }
 0x2d6   : > { %482 = vrot.lane.b32.xlu0 %v1277_v19, %s1191_s16  ;;  %s219_s16 = scalar_lea.vmem %s1401_s5, %s1009_s20 }
 0x341   : > { %v357_v49 = vpop.xlane.xlu1 %356 }
 0x342   : > { %v358_v50 = vsub.f32 %v354_v37, %v357_v49 }
 0x344   : > { %v359_v51 = vmul.f32 1.442695, %v358_v50 }
 0x346   : > { %1161 = vpow2.f32 %v359_v51 }
 0x349   : > { %v472_v52 = vpop.xlane.xlu0 %471 }
 0x34a   : > { %v473_v53 = vsub.f32 %v469_v45, %v472_v52 }
 0x34c   : > { %v474_v54 = vmul.f32 1.442695, %v473_v53 }
 0x34d   : > { %v483_v2 = vpop.permute.xlu0 %482 }
 0x34e   : > { %1163 = vpow2.f32 %v474_v54  ;;  %v488_v4 = vsel %vm372_vm4, %v483_v2, 0 }
 0x353   : > { %v1162_v55 = vpop.eup %1161 }
 0x354   : > { %v361_v56 = vsel %vm307_vm2, %v1162_v55, 0.0 }
 0x355   : > { %362 = vadd.xlane.f32.xlu1 %v361_v56 }
 0x35b   : > { %v1164_v57 = vpop.eup %1163 }
 0x35c   : > { %v476_v58 = vsel %vm307_vm2, %v1164_v57, 0.0 }
 0x35d   : > { %477 = vadd.xlane.f32.xlu1 %v476_v58 }
 0x36e   : > { %367 = vrot.lane.b32.xlu1 %v1277_v19, %s1192_s17 }
 0x372   : > { %629 = vrot.lane.b32.xlu1 %v1277_v19, %s1193_s21 }
 0x376   : > { %627 = vrot.lane.b32.xlu1 %v1277_v19, %s1194_s22 }
 0x3de   : > { %v363_v59 = vpop.xlane.xlu1 %362 }
 0x3df   : > { %1165 = vrcp.f32 %v363_v59 }
 0x3e6   : > { %v478_v60 = vpop.xlane.xlu1 %477 }
 0x3e7   : > { %1167 = vrcp.f32 %v478_v60 }
 0x3ea   : > { %v368_v61 = vpop.permute.xlu1 %367 }
 0x3eb   : > { %v374_v62 = vsel %vm372_vm4, %v368_v61, 0  ;;  %v298_v61 = vld [vmem:[%s1399_s3 + $0x10] sm:$0xff] }
 0x3ec   : > { %v1166_v63 = vpop.eup %1165  ;;  %1072 = vmatpush3.bf16.msra.mxu0 %v374_v62  ;;  %v299_v62 = vld [vmem:[%s1399_s3 + $0x18] sm:$0xff] }
 0x3ed   : > { %1083 = vmatprep.subr.bf16.mxu0 %v1185_v6  ;;  %v365_v1 = vmul.f32 %v1166_v63, %v1162_v55  ;;  %v301_v63 = vpack.c.bf16 %v299_v62, %v298_v61 }
 0x3ee   : > { %v630_v21 = vpop.permute.xlu1 %629 }
 0x3ef   : > { %v366_v3 = vpack.c.bf16 %v365_v1, %v365_v1  ;;  %v635_v25 = vsel %vm307_vm2, %v630_v21, 0  ;;  %v743_v1 = vsel %vm372_vm4, %v301_v63, 0 }
 0x3f1   : > { %1074 = vmatmul.mubr.msk.bf16.vlgmr.msra.gmra.mxu0 %vm307_vm2, %v366_v3 }
 0x3f2   : > { %1084 = vmatpush3.bf16.msra.mxu0 %v488_v4  ;;  %1085 = vmatprep.mubr.msk.bf16.mxu0 %vm1186_vm1, %v1185_v6  ;;  %v628_v28 = vpop.permute.xlu1 %627 }
 0x3f3   : > { %1095 = vmatprep.subr.bf16.mxu0 %v1185_v6 }
 0x3f4   : > { %v1168_v5 = vpop.eup %1167 }
 0x3f5   : > { %v480_v7 = vmul.f32 %v1168_v5, %v1164_v57 }
 0x3f7   : > { %v481_v8 = vpack.c.bf16 %v480_v7, %v480_v7 }
 0x3f9   : > { %1086 = vmatmul.mubr.msk.bf16.vlgmr.msra.gmra.mxu0 %vm307_vm2, %v481_v8  ;;  %v1024_v8 = vld [vmem:[%s1400_s4 + $0x18] sm:$0xff] }
 0x3fa   : > { %1097 = vmatprep.mubr.msk.bf16.mxu0 %vm1186_vm1, %v1185_v6  ;;  %1096 = vmatpush3.bf16.msra.mxu0 %v583_v12 }
 0x3fb   : > { %1107 = vmatprep.subr.bf16.mxu0 %v1185_v6 }
 0x4b1   : > { %v410_v15 = vpop.f32.mrf.mxu0 }
 0x4b2   : > { %v416_v16 = vpack.c.bf16 %v410_v15, %v410_v15 }
 0x4b3   : > { %v1075_v17 = vpop.f32.mrf.mxu0 }
 0x4b4   : > { %1098 = vmatmul.mubr.msk.bf16.vlgmr.msra.gmra.mxu0 %vm307_vm2, %v416_v16 }
 0x4b5   : > { %v413_v18 = vpop.f32.mrf.mxu0  ;;  %1109 = vmatprep.mubr.msk.bf16.mxu0 %vm1186_vm1, %v1185_v6 }
 0x4b7   : > { %v1076_v20 = vpop.f32.mrf.mxu0 }
 0x4b9   : > { %v524_v22 = vpop.f32.mrf.mxu0 }
 0x4ba   : > { %v530_v23 = vpack.c.bf16 %v524_v22, %v524_v22 }
 0x4bb   : > { %v1087_v24 = vpop.f32.mrf.mxu0 }
 0x4bc   : > { %1092 = vmatmul.mubr.msk.bf16.vlgmr.msra.gmra.mxu1 %vm307_vm2, %v530_v23 }
 0x4bd   : > { %1102 = vmatpush3.bf16.xpose.msra.mxu1 %v635_v25  ;;  %v527_v26 = vpop.f32.mrf.mxu0  ;;  %1103 = vmatprep.mubr.msk.bf16.mxu1 %vm1186_vm1, %v1185_v6 }
 0x4be   : > { %1113 = vmatprep.subr.bf16.mxu1 %v1185_v6  ;;  %v901_v26 = vrot.slane %v301_v63, 4 }
 0x4bf   : > { %v1088_v27 = vpop.f32.mrf.mxu0 }
 0x4c4   : > { %1104 = vmatmul.mubr.msk.bf16.vlgmr.msra.gmra.mxu1 %vm307_vm2, %v628_v28 }
 0x4c5   : > { %1115 = vmatprep.mubr.msk.bf16.mxu1 %vm1186_vm1, %v1185_v6  ;;  %1114 = vmatpush3.bf16.msra.mxu1 %v743_v1 }
 0x4c6   : > { %1125 = vmatprep.subr.bf16.mxu1 %v1185_v6 }
 0x574   : > { %v619_v29 = vpop.f32.mrf.mxu0 }
 0x576   : > { %v1099_v30 = vpop.f32.mrf.mxu0 }
 0x578   : > { %v622_v31 = vpop.f32.mrf.mxu0 }
 0x57a   : > { %v1100_v32 = vpop.f32.mrf.mxu0 }
 0x57c   : > { %v573_v33 = vpop.f32.mrf.mxu1 }
 0x57d   : > { %v1342_v35 = vadd.f32 %v619_v29, %v573_v33 }
 0x57e   : > { %v1093_v36 = vpop.f32.mrf.mxu1 }
 0x580   : > { %v576_v37 = vpop.f32.mrf.mxu1 }
 0x582   : > { %v1094_v38 = vpop.f32.mrf.mxu1 }
 0x584   : > { %v671_v40 = vpop.f32.mrf.mxu1 }
 0x585   : > { %v672_v41 = vadd.f32 %v1020_v39, %v671_v40 }
 0x586   : > { %v1105_v42 = vpop.f32.mrf.mxu1 }
 0x587   : > { %v677_v43 = vadd.f32 %v672_v41, %v1296_v34 }
 0x588   : > { %v674_v44 = vpop.f32.mrf.mxu1 }
 0x589   : > { %v678_v45 = vsel %vm307_vm2, %v677_v43, -inf }
 0x58a   : > { %679 = vmax.xlane.f32.xlu1 %v678_v45  ;;  %v1106_v46 = vpop.f32.mrf.mxu1 }
 0x59b   : > { %790 = vrot.lane.b32.xlu1 %v1277_v19, %s1195_s29 }
 0x59f   : > { %788 = vrot.lane.b32.xlu1 %v1277_v19, %s1196_s30 }
 0x613   : > { %v680_v47 = vpop.xlane.xlu1 %679 }
 0x614   : > { %v681_v48 = vsub.f32 %v677_v43, %v680_v47 }
 0x616   : > { %v682_v49 = vmul.f32 1.442695, %v681_v48 }
 0x617   : > { %v791_v57 = vpop.permute.xlu1 %790 }
 0x618   : > { %1169 = vpow2.f32 %v682_v49  ;;  %v796_v59 = vsel %vm307_vm2, %v791_v57, 0 }
 0x61b   : > { %v789_v60 = vpop.permute.xlu1 %788 }
 0x625   : > { %v1170_v50 = vpop.eup %1169 }
 0x626   : > { %v684_v51 = vsel %vm307_vm2, %v1170_v50, 0.0 }
 0x627   : > { %685 = vadd.xlane.f32.xlu0 %v684_v51 }
 0x63d   : > { %690 = vrot.lane.b32.xlu0 %v1277_v19, %s1197_s6 }
 0x6b0   : > { %v686_v52 = vpop.xlane.xlu0 %685 }
 0x6b1   : > { %1171 = vrcp.f32 %v686_v52 }
 0x6b4   : > { %v691_v53 = vpop.permute.xlu0 %690 }
 0x6b5   : > { %v696_v54 = vsel %vm372_vm4, %v691_v53, 0 }
 0x6b6   : > { %1108 = vmatpush3.bf16.msra.mxu0 %v696_v54 }
 0x6b7   : > { %1119 = vmatprep.subr.bf16.mxu0 %v1185_v6 }
 0x6be   : > { %v1172_v55 = vpop.eup %1171 }
 0x6bf   : > { %v688_v56 = vmul.f32 %v1172_v55, %v1170_v50 }
 0x6c1   : > { %v689_v58 = vpack.c.bf16 %v688_v56, %v688_v56 }
 0x6c3   : > { %1110 = vmatmul.mubr.msk.bf16.vlgmr.msra.gmra.mxu0 %vm307_vm2, %v689_v58 }
 0x6c4   : > { %1120 = vmatpush3.bf16.xpose.msra.mxu0 %v796_v59  ;;  %1121 = vmatprep.mubr.msk.bf16.mxu0 %vm1186_vm1, %v1185_v6 }
 0x6c5   : > { %1131 = vmatprep.subr.bf16.mxu0 %v1185_v6 }
 0x6cb   : > { %1122 = vmatmul.mubr.msk.bf16.vlgmr.msra.gmra.mxu0 %vm307_vm2, %v789_v60 }
 0x6cc   : > { %1133 = vmatprep.mubr.msk.bf16.mxu0 %vm1186_vm1, %v1185_v6 }
 0x783   : > { %v732_v2 = vpop.f32.mrf.mxu0 }
 0x784   : > { %v738_v3 = vpack.c.bf16 %v732_v2, %v732_v2 }
 0x785   : > { %v1111_v4 = vpop.f32.mrf.mxu0 }
 0x786   : > { %1116 = vmatmul.mubr.msk.bf16.vlgmr.msra.gmra.mxu1 %vm307_vm2, %v738_v3 }
 0x787   : > { %v735_v5 = vpop.f32.mrf.mxu0  ;;  %1127 = vmatprep.mubr.msk.bf16.mxu1 %vm1186_vm1, %v1185_v6 }
 0x789   : > { %v1112_v7 = vpop.f32.mrf.mxu0 }
 0x78b   : > { %v832_v9 = vpop.f32.mrf.mxu0 }
 0x78c   : > { %v833_v10 = vadd.f32 %v1024_v8, %v832_v9 }
 0x78d   : > { %v1123_v11 = vpop.f32.mrf.mxu0 }
 0x78e   : > { %v838_v12 = vadd.f32 %v833_v10, %v1296_v34 }
 0x78f   : > { %v835_v13 = vpop.f32.mrf.mxu0 }
 0x790   : > { %v839_v14 = vsel %vm307_vm2, %v838_v12, -inf }
 0x791   : > { %840 = vmax.xlane.f32.xlu0 %v839_v14  ;;  %v1124_v15 = vpop.f32.mrf.mxu0 }
 0x7a7   : > { %851 = vrot.lane.b32.xlu0 %v1277_v19, %s1198_s13  ;;  %v906_v19 = vsel %vm372_vm4, %v901_v26, 0 }
 0x7a8   : > { %1132 = vmatpush3.bf16.msra.mxu0 %v906_v19 }
 0x81a   : > { %v841_v16 = vpop.xlane.xlu0 %840 }
 0x81b   : > { %v842_v6 = vsub.f32 %v838_v12, %v841_v16 }
 0x81d   : > { %v843_v17 = vmul.f32 1.442695, %v842_v6 }
 0x81e   : > { %v852_v18 = vpop.permute.xlu0 %851 }
 0x81f   : > { %1173 = vpow2.f32 %v843_v17  ;;  %v857_v20 = vsel %vm372_vm4, %v852_v18, 0 }
 0x820   : > { %1126 = vmatpush3.bf16.msra.mxu1 %v857_v20 }
 0x82c   : > { %v1174_v21 = vpop.eup %1173 }
 0x82d   : > { %v845_v22 = vsel %vm307_vm2, %v1174_v21, 0.0 }
 0x82e   : > { %846 = vadd.xlane.f32.xlu1 %v845_v22 }
 0x846   : > { %v779_v34 = vpop.f32.mrf.mxu1 }
 0x847   : > { %v785_v23 = vadd.f32 %v779_v34, %v1342_v35 }
 0x848   : > { %v1117_v24 = vpop.f32.mrf.mxu1 }
 0x84a   : > { %v782_v25 = vpop.f32.mrf.mxu1 }
 0x84c   : > { %v1118_v27 = vpop.f32.mrf.mxu1 }
 0x8b7   : > { %v847_v28 = vpop.xlane.xlu1 %846 }
 0x8b8   : > { %1175 = vrcp.f32 %v847_v28 }
 0x8c5   : > { %v1176_v29 = vpop.eup %1175 }
 0x8c6   : > { %v849_v30 = vmul.f32 %v1176_v29, %v1174_v21 }
 0x8c8   : > { %v850_v31 = vpack.c.bf16 %v849_v30, %v849_v30 }
 0x8ca   : > { %1128 = vmatmul.mubr.msk.bf16.vlgmr.msra.gmra.mxu1 %vm307_vm2, %v850_v31 }
 0x98a   : > { %v893_v32 = vpop.f32.mrf.mxu1 }
 0x98b   : > { %v899_v33 = vpack.c.bf16 %v893_v32, %v893_v32 }
 0x98c   : > { %v1129_v36 = vpop.f32.mrf.mxu1 }
 0x98d   : > { %1134 = vmatmul.mubr.msk.bf16.vlgmr.msra.gmra.mxu0 %vm307_vm2, %v899_v33 }
 0x98e   : > { %v896_v35 = vpop.f32.mrf.mxu1 }
 0x990   : > { %v1130_v37 = vpop.f32.mrf.mxu1 }
 0xa4d   : > { %v942_v38 = vpop.f32.mrf.mxu0 }
 0xa4e   : > { %v948_v39 = vadd.f32 %v942_v38, %v785_v23 }
 0xa4f   : > { %v1135_v40 = vpop.f32.mrf.mxu0 }
 0xa50   : > { %v949_v41 = vadd.f32 %v948_v39, %v1245_v0 }
 0xa51   : > { %v945_v42 = vpop.f32.mrf.mxu0 }
 0xa52   : > { %950 = vst.msk [vmem:[%s219_s16] sm:$0xff] %vm224_vm0, %v949_v41 }
 0xa53   : > { %v1136_v43 = vpop.f32.mrf.mxu0 }
 0xa54 PF: > { %s15_s18 = sadd.s32 1, %s1183_s18  }
 0xa55   : > { %p12_p4 = scmp.ge.s32.totalorder %s15_s18, 4  }
 0xa57   :  { %14 = sbr.rel (!%p12_p4) target bundleno = 1 (0x1), region = 73 }

// kernel: t5_decoder_stack_forward.8
= control target key start
LH: loop header
LB: loop body
LE: loop exit
PB: predicated region body
PF: predicated region fallthrough
CT: control target
= control target key end

     0   :  { %s1324_s21 = smov 0   ;;  %s1493_s0 = inlined_call_operand.vmem [shape: f32[2,8,32], index: 0, kind: input, shape index: {}]   ;;  %s1494_s1 = inlined_call_operand.vmem [shape: f32[2,8,32], index: 1, kind: input, shape index: {}]   ;;  %s1495_s2 = inlined_call_operand.vmem [shape: f32[1,32], index: 2, kind: input, shape index: {}]   ;;  %s1496_s3 = inlined_call_operand.vmem [shape: f32[32,32], index: 3, kind: input, shape index: {}]   ;;  %s1497_s4 = inlined_call_operand.vmem [shape: f32[32,64], index: 4, kind: input, shape index: {}]   ;;  %s1498_s5 = inlined_call_operand.vmem [shape: f32[32,32], index: 5, kind: input, shape index: {}]   ;;  %s1499_s6 = inlined_call_operand.vmem [shape: f32[2,8,32], index: 6, kind: output, shape index: {}]  }
   0x1 LB: > { %s1094_s22 = sadd.s32 4294967295, %s1278_s21   ;;  %p1098_p0 = scmp.ge.s32.totalorder %s1278_s21, 1  ;;  %s1278_s21 = sphi %s1324_s21, %s16_s21  }
   0x2   : > { %p220_p1 = scmp.lt.s32.totalorder %s1278_s21, 3 }
   0x4   : > { %p221_p2 = pnand %p1098_p0, %p220_p1 }
   0x5   : > { %p252_p3 = scmp.lt.s32.totalorder (!%p221_p2), %s1094_s22, 1  ;;  %s1283_s27 = smov (!%p221_p2), 88  }
   0x6   : > { %224 = sbr.rel (%p221_p2) target bundleno = 2616 (0xa38), region = 44  ;;  %s1284_s28 = smov (!%p221_p2), 96  }
   0x7   : > { %s1285_s29 = smov (!%p221_p2), 112   ;;  %s1286_s10 = smov (!%p221_p2), 80  }
   0x8   : > { %s1287_s11 = smov (!%p221_p2), 104   ;;  %s1288_s16 = smov (!%p221_p2), 72  }
   0xb   : > { %s1501_s22 = smov (!%p252_p3, %s1094_s22), 1  ;;  %vm269_vm0 = vcmask 261120   ;;  %v338_v3 = vld [vmem:[%s1497_s4 + $0x10] sm:$0xff]  ;;  %v339_v4 = vld [vmem:[%s1497_s4 + $0x18] sm:$0xff]  ;;  %v1280_v6 = vmov 0.0   ;;  %v336_v7 = vld [vmem:[%s1497_s4] sm:$0xff] }
   0xc   : > { %s1332_s23 = sshll.u32 %s1501_s22, 3  ;;  %v341_v5 = vpack.c.bf16 %v339_v4, %v338_v3  ;;  %1157 = vmatprep.subr.bf16.mxu1 %v1280_v6  ;;  %1149 = vmatprep.subr.bf16.mxu0 %v1280_v6  ;;  %v337_v8 = vld [vmem:[%s1497_s4 + $0x8] sm:$0xff]  ;;  %v288_v9 = vld [vmem:[%s1496_s3 + $0x10] sm:$0xff]  ;;  %vm1281_vm1 = vmmov 0   ;;  %v289_v12 = vld [vmem:[%s1496_s3 + $0x18] sm:$0xff]  ;;  %vm393_vm2 = vcmask 64512  }
   0xd   : > { %s255_s26 = scalar_lea.vmem %s1493_s0, %s1332_s23  ;;  %s259_s13 = scalar_lea.vmem %s1494_s1, %s1332_s23  ;;  %v340_v10 = vpack.c.bf16 %v337_v8, %v336_v7  ;;  %1161 = vmatprep.mubr.msk.bf16.mxu1 %vm1281_vm1, %v1280_v6  ;;  %v286_v13 = vld [vmem:[%s1496_s3] sm:$0xff]  ;;  %1153 = vmatprep.mubr.msk.bf16.mxu0 %vm1281_vm1, %v1280_v6  ;;  %v291_v15 = vpack.c.bf16 %v289_v12, %v288_v9  ;;  %v287_v16 = vld [vmem:[%s1496_s3 + $0x8] sm:$0xff]  ;;  %vm458_vm3 = vcmask 1043456  }
   0xe   : > { %v1338_v0 = vld [vmem:[%s255_s26] sm:$0xff]  ;;  %1158 = vmatpush3.bf16.msra.mxu1 %v341_v5  ;;  %v290_v17 = vpack.c.bf16 %v287_v16, %v286_v13  ;;  %s1282_s26 = smov 120   ;;  %s263_s19 = scalar_lea.vmem %s1499_s6, %s1332_s23 }
   0xf   : > { %v268_v1 = vmul.f32 %v1338_v0, %v1338_v0  ;;  %1159 = vmatprep.subr.bf16.mxu1 %v1280_v6  ;;  %v266_v11 = vld [vmem:[%s259_s13] sm:$0xff]  ;;  %1150 = vmatpush3.bf16.msra.mxu0 %v291_v15 }
  0x10   : > { %v335_v14 = vpack.c.bf16 %v266_v11, %v266_v11  ;;  %1151 = vmatprep.subr.bf16.mxu0 %v1280_v6  ;;  %v1102_v22 = vld [vmem:[%s1495_s2] ss:$0 sm:$0xff]  ;;  %v386_v11 = vld [vmem:[%s1498_s5 + $0x8] sm:$0xff] }
  0x11   : > { %v270_v2 = vsel %vm269_vm0, %v268_v1, 0.0 }
  0x12   : > { %271 = vadd.xlane.f32.xlu0 %v270_v2  ;;  %1160 = vmatpush3.bf16.msra.mxu1 %v340_v10  ;;  %v385_v10 = vld [vmem:[%s1498_s5] sm:$0xff] }
  0x13   : > { %1171 = vmatprep.subr.bf16.mxu1 %v1280_v6  ;;  %1152 = vmatpush3.bf16.msra.mxu0 %v290_v17  ;;  %v389_v12 = vpack.c.bf16 %v386_v11, %v385_v10 }
  0x14   : > { %1165 = vmatprep.subr.bf16.mxu0 %v1280_v6 }
  0x15   : > { %1162 = vmatmul.mubr.msk.bf16.vlgmr.msra.gmra.mxu1 %vm269_vm0, %v335_v14  ;;  %v667_v13 = vsel %vm458_vm3, %v389_v12, 0  ;;  %v616_v14 = vrot.slane %v389_v12, 4 }
  0x16   : > { %1173 = vmatprep.mubr.msk.bf16.mxu1 %vm1281_vm1, %v1280_v6 }
  0x17   : > { %v621_v15 = vsel %vm458_vm3, %v616_v14, 0 }
  0x9b   : > { %v272_v18 = vpop.xlane.xlu0 %271 }
  0x9c   : > { %v274_v19 = vmul.f32 0.03125, %v272_v18 }
  0x9e   : > { %v275_v20 = vadd.f32 1e-06, %v274_v19 }
  0xa0   : > { %1254 = vrsqrt.f32 %v275_v20 }
  0xad   : > { %v1255_v21 = vpop.eup %1254 }
  0xae   : > { %v277_v23 = vmul.f32 %v1255_v21, %v1338_v0 }
  0xb0   : > { %v284_v24 = vmul.f32 %v1102_v22, %v277_v23 }
  0xb2   : > { %v285_v25 = vpack.c.bf16 %v284_v24, %v284_v24 }
  0xb4   : > { %1154 = vmatmul.mubr.msk.bf16.vlgmr.msra.gmra.mxu0 %vm269_vm0, %v285_v25 }
  0xb5   : > { %1167 = vmatprep.mubr.msk.bf16.mxu0 %vm1281_vm1, %v1280_v6 }
  0xd5   : > { %v379_v26 = vpop.f32.mrf.mxu1 }
  0xd6   : > { %v1391_v27 = vpack.c.bf16 %v379_v26, %v379_v26 }
  0xd7   : > { %v1163_v28 = vpop.f32.mrf.mxu1 }
  0xd8   : > { %506 = vrot.lane.b32.xlu0 %v1391_v27, %s1282_s26  ;;  %v398_v29 = vsel %vm393_vm2, %v1391_v27, 0 }
  0xd9   : > { %v382_v30 = vpop.f32.mrf.mxu1  ;;  %1166 = vmatpush3.bf16.xpose.msra.mxu0 %v398_v29 }
  0xda   : > { %1177 = vmatprep.subr.bf16.mxu0 %v1280_v6 }
  0xdb   : > { %v1164_v31 = vpop.f32.mrf.mxu1 }
 0x14a   : > { %v507_v32 = vpop.permute.xlu0 %506 }
 0x14b   : > { %v512_v35 = vsel %vm393_vm2, %v507_v32, 0 }
 0x174   : > { %v329_v33 = vpop.f32.mrf.mxu0 }
 0x175   : > { %v1397_v34 = vpack.c.bf16 %v329_v33, %v329_v33 }
 0x176   : > { %v1155_v36 = vpop.f32.mrf.mxu0 }
 0x177   : > { %504 = vrot.lane.b32.xlu1 %v1397_v34, %s1282_s26  ;;  %1168 = vmatmul.mubr.msk.bf16.vlgmr.msra.gmra.mxu0 %vm393_vm2, %v1397_v34 }
 0x178   : > { %v332_v37 = vpop.f32.mrf.mxu0  ;;  %1178 = vmatpush3.bf16.xpose.msra.mxu0 %v512_v35  ;;  %1179 = vmatprep.mubr.msk.bf16.mxu0 %vm1281_vm1, %v1280_v6 }
 0x179   : > { %1189 = vmatprep.subr.bf16.mxu0 %v1280_v6 }
 0x17a   : > { %v1156_v38 = vpop.f32.mrf.mxu0 }
 0x1e9   : > { %v505_v39 = vpop.permute.xlu1 %504 }
 0x1ea   : > { %1180 = vmatmul.mubr.msk.bf16.vlgmr.msra.gmra.mxu0 %vm393_vm2, %v505_v39 }
 0x1eb   : > { %1191 = vmatprep.mubr.msk.bf16.mxu0 %vm1281_vm1, %v1280_v6  ;;  %1190 = vmatpush3.bf16.msra.mxu0 %v621_v15 }
 0x1ec   : > { %1201 = vmatprep.subr.bf16.mxu0 %v1280_v6 }
 0x237   : > { %v434_v40 = vpop.f32.mrf.mxu0 }
 0x238   : > { %v440_v41 = vsel %vm393_vm2, %v434_v40, -inf }
 0x239   : > { %441 = vmax.xlane.f32.xlu1 %v440_v41  ;;  %v1169_v42 = vpop.f32.mrf.mxu0 }
 0x23b   : > { %v437_v43 = vpop.f32.mrf.mxu0 }
 0x23d   : > { %v1170_v44 = vpop.f32.mrf.mxu0 }
 0x2aa   : > { %v548_v45 = vpop.f32.mrf.mxu0 }
 0x2ab   : > { %v554_v46 = vsel %vm393_vm2, %v548_v45, -inf }
 0x2ac   : > { %555 = vmax.xlane.f32.xlu0 %v554_v46  ;;  %v1181_v47 = vpop.f32.mrf.mxu0 }
 0x2ae   : > { %v551_v48 = vpop.f32.mrf.mxu0 }
 0x2b0   : > { %v1182_v49 = vpop.f32.mrf.mxu0 }
 0x2c2   : > { %v442_v50 = vpop.xlane.xlu1 %441  ;;  %566 = vrot.lane.b32.xlu0 %v1391_v27, %s1283_s27 }
 0x2c3   : > { %v443_v51 = vsub.f32 %v434_v40, %v442_v50 }
 0x2c5   : > { %v444_v52 = vmul.f32 1.442695, %v443_v51 }
 0x2c7   : > { %1256 = vpow2.f32 %v444_v52 }
 0x2d4   : > { %v1257_v53 = vpop.eup %1256 }
 0x2d5   : > { %v446_v54 = vsel %vm393_vm2, %v1257_v53, 0.0 }
 0x2d6   : > { %447 = vadd.xlane.f32.xlu1 %v446_v54 }
 0x335   : > { %v556_v55 = vpop.xlane.xlu0 %555 }
 0x336   : > { %v557_v56 = vsub.f32 %v548_v45, %v556_v55 }
 0x338   : > { %v558_v57 = vmul.f32 1.442695, %v557_v56 }
 0x339   : > { %v567_v3 = vpop.permute.xlu0 %566 }
 0x33a   : > { %1258 = vpow2.f32 %v558_v57  ;;  %v572_v5 = vsel %vm458_vm3, %v567_v3, 0 }
 0x347   : > { %v1259_v58 = vpop.eup %1258 }
 0x348   : > { %v560_v59 = vsel %vm393_vm2, %v1259_v58, 0.0 }
 0x349   : > { %561 = vadd.xlane.f32.xlu1 %v560_v59  ;;  %v388_v59 = vld [vmem:[%s1498_s5 + $0x18] sm:$0xff] }
 0x35a   : > { %453 = vrot.lane.b32.xlu1 %v1391_v27, %s1284_s28 }
 0x35e   : > { %711 = vrot.lane.b32.xlu1 %v1391_v27, %s1285_s29 }
 0x35f   : > { %v448_v60 = vpop.xlane.xlu1 %447 }
 0x360   : > { %1260 = vrcp.f32 %v448_v60 }
 0x362   : > { %709 = vrot.lane.b32.xlu1 %v1397_v34, %s1285_s29 }
 0x36d   : > { %v1261_v61 = vpop.eup %1260 }
 0x36e   : > { %v450_v63 = vmul.f32 %v1261_v61, %v1257_v53 }
 0x370   : > { %v451_v4 = vpack.c.bf16 %v450_v63, %v450_v63 }
 0x3d2   : > { %v562_v62 = vpop.xlane.xlu1 %561 }
 0x3d3   : > { %1262 = vrcp.f32 %v562_v62 }
 0x3d6   : > { %v454_v1 = vpop.permute.xlu1 %453 }
 0x3d7   : > { %v460_v2 = vsel %vm458_vm3, %v454_v1, 0 }
 0x3d8   : > { %1172 = vmatpush3.bf16.msra.mxu1 %v460_v2 }
 0x3d9   : > { %1183 = vmatprep.subr.bf16.mxu1 %v1280_v6 }
 0x3da   : > { %v712_v21 = vpop.permute.xlu1 %711 }
 0x3db   : > { %1174 = vmatmul.mubr.msk.bf16.vlgmr.msra.gmra.mxu1 %vm393_vm2, %v451_v4  ;;  %v717_v25 = vsel %vm393_vm2, %v712_v21, 0 }
 0x3dc   : > { %1184 = vmatpush3.bf16.msra.mxu1 %v572_v5  ;;  %1185 = vmatprep.mubr.msk.bf16.mxu1 %vm1281_vm1, %v1280_v6 }
 0x3dd   : > { %1195 = vmatprep.subr.bf16.mxu1 %v1280_v6 }
 0x3de   : > { %v710_v29 = vpop.permute.xlu1 %709 }
 0x3e0   : > { %v1263_v7 = vpop.eup %1262 }
 0x3e1   : > { %v564_v8 = vmul.f32 %v1263_v7, %v1259_v58  ;;  %v387_v58 = vld [vmem:[%s1498_s5 + $0x10] sm:$0xff] }
 0x3e2   : > { %v390_v60 = vpack.c.bf16 %v388_v59, %v387_v58 }
 0x3e3   : > { %v565_v9 = vpack.c.bf16 %v564_v8, %v564_v8 }
 0x3e4   : > { %v824_v61 = vsel %vm458_vm3, %v390_v60, 0  ;;  %v979_v15 = vrot.slane %v390_v60, 4 }
 0x3e5   : > { %1186 = vmatmul.mubr.msk.bf16.vlgmr.msra.gmra.mxu1 %vm393_vm2, %v565_v9 }
 0x3e6   : > { %1197 = vmatprep.mubr.msk.bf16.mxu1 %vm1281_vm1, %v1280_v6  ;;  %1196 = vmatpush3.bf16.msra.mxu1 %v667_v13 }
 0x3e7   : > { %1207 = vmatprep.subr.bf16.mxu1 %v1280_v6 }
 0x49b   : > { %v496_v16 = vpop.f32.mrf.mxu1 }
 0x49c   : > { %v502_v17 = vpack.c.bf16 %v496_v16, %v496_v16 }
 0x49d   : > { %v1175_v18 = vpop.f32.mrf.mxu1 }
 0x49e   : > { %1198 = vmatmul.mubr.msk.bf16.vlgmr.msra.gmra.mxu1 %vm393_vm2, %v502_v17  ;;  %v984_v18 = vsel %vm458_vm3, %v979_v15, 0 }
 0x49f   : > { %v499_v19 = vpop.f32.mrf.mxu1  ;;  %1209 = vmatprep.mubr.msk.bf16.mxu1 %vm1281_vm1, %v1280_v6 }
 0x4a1   : > { %v1176_v20 = vpop.f32.mrf.mxu1 }
 0x4a5   : > { %v608_v22 = vpop.f32.mrf.mxu1 }
 0x4a6   : > { %v614_v23 = vpack.c.bf16 %v608_v22, %v608_v22 }
 0x4a7   : > { %v1187_v24 = vpop.f32.mrf.mxu1 }
 0x4a8   : > { %1192 = vmatmul.mubr.msk.bf16.vlgmr.msra.gmra.mxu0 %vm393_vm2, %v614_v23 }
 0x4a9   : > { %1202 = vmatpush3.bf16.xpose.msra.mxu0 %v717_v25  ;;  %v611_v26 = vpop.f32.mrf.mxu1  ;;  %1203 = vmatprep.mubr.msk.bf16.mxu0 %vm1281_vm1, %v1280_v6 }
 0x4aa   : > { %1213 = vmatprep.subr.bf16.mxu0 %v1280_v6 }
 0x4ab   : > { %v1188_v28 = vpop.f32.mrf.mxu1 }
 0x4b0   : > { %1204 = vmatmul.mubr.msk.bf16.vlgmr.msra.gmra.mxu0 %vm393_vm2, %v710_v29 }
 0x4b1   : > { %1215 = vmatprep.mubr.msk.bf16.mxu0 %vm1281_vm1, %v1280_v6  ;;  %1214 = vmatpush3.bf16.msra.mxu0 %v824_v61 }
 0x4b2   : > { %1225 = vmatprep.subr.bf16.mxu0 %v1280_v6 }
 0x55e   : > { %v703_v30 = vpop.f32.mrf.mxu1 }
 0x560   : > { %v1199_v31 = vpop.f32.mrf.mxu1 }
 0x562   : > { %v706_v32 = vpop.f32.mrf.mxu1 }
 0x564   : > { %v1200_v33 = vpop.f32.mrf.mxu1 }
 0x568   : > { %v657_v35 = vpop.f32.mrf.mxu0 }
 0x569   : > { %v1448_v36 = vadd.f32 %v703_v30, %v657_v35 }
 0x56a   : > { %v1193_v37 = vpop.f32.mrf.mxu0 }
 0x56c   : > { %v660_v38 = vpop.f32.mrf.mxu0 }
 0x56e   : > { %v1194_v39 = vpop.f32.mrf.mxu0 }
 0x570   : > { %v753_v40 = vpop.f32.mrf.mxu0 }
 0x571   : > { %v759_v41 = vsel %vm393_vm2, %v753_v40, -inf }
 0x572   : > { %760 = vmax.xlane.f32.xlu1 %v759_v41  ;;  %v1205_v42 = vpop.f32.mrf.mxu0 }
 0x574   : > { %v756_v43 = vpop.f32.mrf.mxu0 }
 0x576   : > { %v1206_v44 = vpop.f32.mrf.mxu0 }
 0x583   : > { %771 = vrot.lane.b32.xlu1 %v1391_v27, %s1286_s10 }
 0x587   : > { %867 = vrot.lane.b32.xlu1 %v1397_v34, %s1287_s11 }
 0x5fb   : > { %v761_v45 = vpop.xlane.xlu1 %760 }
 0x5fc   : > { %v762_v46 = vsub.f32 %v753_v40, %v761_v45 }
 0x5fe   : > { %v763_v47 = vmul.f32 1.442695, %v762_v46 }
 0x5ff   : > { %v772_v48 = vpop.permute.xlu1 %771 }
 0x600   : > { %1264 = vpow2.f32 %v763_v47  ;;  %v777_v49 = vsel %vm458_vm3, %v772_v48, 0 }
 0x601   : > { %1208 = vmatpush3.bf16.msra.mxu1 %v777_v49 }
 0x602   : > { %1219 = vmatprep.subr.bf16.mxu1 %v1280_v6 }
 0x603   : > { %v868_v57 = vpop.permute.xlu1 %867 }
 0x60d   : > { %v1265_v50 = vpop.eup %1264 }
 0x60e   : > { %v765_v51 = vsel %vm393_vm2, %v1265_v50, 0.0 }
 0x60f   : > { %766 = vadd.xlane.f32.xlu0 %v765_v51 }
 0x625   : > { %869 = vrot.lane.b32.xlu0 %v1391_v27, %s1287_s11 }
 0x698   : > { %v767_v52 = vpop.xlane.xlu0 %766 }
 0x699   : > { %1266 = vrcp.f32 %v767_v52 }
 0x69c   : > { %v870_v54 = vpop.permute.xlu0 %869 }
 0x69d   : > { %v875_v56 = vsel %vm393_vm2, %v870_v54, 0 }
 0x6a6   : > { %v1267_v53 = vpop.eup %1266 }
 0x6a7   : > { %v769_v34 = vmul.f32 %v1267_v53, %v1265_v50 }
 0x6a9   : > { %v770_v55 = vpack.c.bf16 %v769_v34, %v769_v34 }
 0x6ab   : > { %1210 = vmatmul.mubr.msk.bf16.vlgmr.msra.gmra.mxu1 %vm393_vm2, %v770_v55 }
 0x6ac   : > { %1220 = vmatpush3.bf16.xpose.msra.mxu1 %v875_v56  ;;  %1221 = vmatprep.mubr.msk.bf16.mxu1 %vm1281_vm1, %v1280_v6 }
 0x6ad   : > { %1231 = vmatprep.subr.bf16.mxu1 %v1280_v6 }
 0x6b3   : > { %1222 = vmatmul.mubr.msk.bf16.vlgmr.msra.gmra.mxu1 %vm393_vm2, %v868_v57 }
 0x6b4   : > { %1233 = vmatprep.mubr.msk.bf16.mxu1 %vm1281_vm1, %v1280_v6  ;;  %1232 = vmatpush3.bf16.msra.mxu1 %v984_v18 }
 0x76b   : > { %v813_v62 = vpop.f32.mrf.mxu1 }
 0x76c   : > { %v819_v63 = vpack.c.bf16 %v813_v62, %v813_v62 }
 0x76d   : > { %v1211_v1 = vpop.f32.mrf.mxu1 }
 0x76e   : > { %1216 = vmatmul.mubr.msk.bf16.vlgmr.msra.gmra.mxu0 %vm393_vm2, %v819_v63 }
 0x76f   : > { %v816_v2 = vpop.f32.mrf.mxu1  ;;  %1227 = vmatprep.mubr.msk.bf16.mxu0 %vm1281_vm1, %v1280_v6 }
 0x771   : > { %v1212_v3 = vpop.f32.mrf.mxu1 }
 0x773   : > { %v911_v4 = vpop.f32.mrf.mxu1 }
 0x774   : > { %v917_v5 = vsel %vm393_vm2, %v911_v4, -inf }
 0x775   : > { %918 = vmax.xlane.f32.xlu1 %v917_v5  ;;  %v1223_v7 = vpop.f32.mrf.mxu1 }
 0x777   : > { %v914_v8 = vpop.f32.mrf.mxu1 }
 0x779   : > { %v1224_v9 = vpop.f32.mrf.mxu1 }
 0x7fe   : > { %v919_v10 = vpop.xlane.xlu1 %918 }
 0x7ff   : > { %v920_v11 = vsub.f32 %v911_v4, %v919_v10 }
 0x801   : > { %v921_v12 = vmul.f32 1.442695, %v920_v11 }
 0x803   : > { %1268 = vpow2.f32 %v921_v12 }
 0x810   : > { %v1269_v13 = vpop.eup %1268 }
 0x811   : > { %v923_v14 = vsel %vm393_vm2, %v1269_v13, 0.0 }
 0x812   : > { %924 = vadd.xlane.f32.xlu0 %v923_v14 }
 0x828   : > { %929 = vrot.lane.b32.xlu0 %v1391_v27, %s1288_s16 }
 0x82e   : > { %v860_v6 = vpop.f32.mrf.mxu0 }
 0x82f   : > { %v866_v16 = vadd.f32 %v860_v6, %v1448_v36 }
 0x830   : > { %v1217_v17 = vpop.f32.mrf.mxu0 }
 0x832   : > { %v863_v19 = vpop.f32.mrf.mxu0 }
 0x834   : > { %v1218_v20 = vpop.f32.mrf.mxu0 }
 0x89b   : > { %v925_v21 = vpop.xlane.xlu0 %924 }
 0x89c   : > { %1270 = vrcp.f32 %v925_v21 }
 0x89f   : > { %v930_v22 = vpop.permute.xlu0 %929 }
 0x8a0   : > { %v935_v23 = vsel %vm458_vm3, %v930_v22, 0 }
 0x8a1   : > { %1226 = vmatpush3.bf16.msra.mxu0 %v935_v23 }
 0x8a9   : > { %v1271_v24 = vpop.eup %1270 }
 0x8aa   : > { %v927_v25 = vmul.f32 %v1271_v24, %v1269_v13 }
 0x8ac   : > { %v928_v27 = vpack.c.bf16 %v927_v25, %v927_v25 }
 0x8ae   : > { %1228 = vmatmul.mubr.msk.bf16.vlgmr.msra.gmra.mxu0 %vm393_vm2, %v928_v27 }
 0x96e   : > { %v971_v26 = vpop.f32.mrf.mxu0 }
 0x96f   : > { %v977_v28 = vpack.c.bf16 %v971_v26, %v971_v26 }
 0x970   : > { %v1229_v29 = vpop.f32.mrf.mxu0 }
 0x971   : > { %1234 = vmatmul.mubr.msk.bf16.vlgmr.msra.gmra.mxu1 %vm393_vm2, %v977_v28 }
 0x972   : > { %v974_v30 = vpop.f32.mrf.mxu0 }
 0x974   : > { %v1230_v31 = vpop.f32.mrf.mxu0 }
 0xa31   : > { %v1020_v32 = vpop.f32.mrf.mxu1 }
 0xa32   : > { %v1026_v33 = vadd.f32 %v1020_v32, %v866_v16 }
 0xa33   : > { %v1235_v35 = vpop.f32.mrf.mxu1 }
 0xa34   : > { %v1027_v36 = vadd.f32 %v1026_v33, %v1338_v0 }
 0xa35   : > { %v1023_v37 = vpop.f32.mrf.mxu1 }
 0xa36   : > { %1028 = vst.msk [vmem:[%s263_s19] sm:$0xff] %vm269_vm0, %v1027_v36 }
 0xa37   : > { %v1236_v38 = vpop.f32.mrf.mxu1 }
 0xa38 PF: > { %s16_s21 = sadd.s32 1, %s1278_s21  }
 0xa39   : > { %p13_p4 = scmp.ge.s32.totalorder %s16_s21, 4  }
 0xa3b   :  { %15 = sbr.rel (!%p13_p4) target bundleno = 1 (0x1), region = 77 }

</bundles_post_ra>
